<compile_context>
chip_gen: v7x
topology: tpu7x:2x2x1
jax: 0.10.0
libtpu: 0.0.40
codegen_flags: <defaults>
</compile_context>

<pallas_src>
import functools

import jax
import jax.numpy as jnp
from jax import lax
from jax.experimental import pallas as pl
from jax.experimental.pallas import tpu as pltpu

_NEG_BIG = -1e30      # finite "minus infinity" bias for padded class columns
                      # (keep finite: -inf would give 0*inf = NaN in the KL term)
_USE_BF16_EXP = True  # bf16 EUP path for the CE-on-probs exps (v6e/v7x);
                      # auto-extended to f32 on v5e.


def _round_up(x, m):
    return ((x + m - 1) // m) * m


def _classifier_loss_kernel(emb1_ref, emb2_ref, w1t_ref, b1_ref, w2t_ref, b2_ref,
                            mask_ref, y_ref, o_ref,
                            kl_acc, ce_acc, nt_acc,
                            *, n_rows, num_class, c_pad, tile_n):
    core = pl.program_id(0)           # "parallel" (megacore) axis
    step = pl.program_id(1)           # "arbitrary" reduction axis over row tiles
    nsteps = pl.num_programs(1)

    @pl.when(step == 0)
    def _init():
        kl_acc[...] = jnp.zeros_like(kl_acc)
        ce_acc[...] = jnp.zeros_like(ce_acc)
        nt_acc[...] = jnp.zeros_like(nt_acc)

    mm_dtype = w1t_ref.dtype
    emb1 = emb1_ref[...].astype(mm_dtype)     # in-kernel cast: no extra HBM pass
    emb2 = emb2_ref[...].astype(mm_dtype)
    mask_col = mask_ref[...]                  # (T, 1) f32; 0 on padded / non-train rows
    y_col = y_ref[...]                        # (T, 1) int32

    # ---- Linear layers (MXU, bf16 inputs, f32 accumulate) -------------------
    pred1 = jnp.dot(emb1, w1t_ref[...], preferred_element_type=jnp.float32) + b1_ref[...]
    pred2 = jnp.dot(emb2, w2t_ref[...], preferred_element_type=jnp.float32) + b2_ref[...]

    # ---- number_stability: subtract per-row max -----------------------------
    pred1 = pred1 - jnp.max(pred1, axis=-1, keepdims=True)
    pred2 = pred2 - jnp.max(pred2, axis=-1, keepdims=True)

    # ---- softmax / log-softmax (exact reciprocals: only T values per step) --
    e1 = jnp.exp(pred1)                       # padded classes: exp(-1e30) == 0
    e2 = jnp.exp(pred2)
    s1 = jnp.sum(e1, axis=-1, keepdims=True)  # (T, 1)
    s2 = jnp.sum(e2, axis=-1, keepdims=True)
    prob1 = e1 * (1.0 / s1)
    prob2 = e2 * (1.0 / s2)
    logp1 = pred1 - jnp.log(s1)
    logp2 = pred2 - jnp.log(s2)

    # Row validity as a (T, 1) column, applied AFTER the lane reduce.
    tile_start = (core * nsteps + step) * tile_n
    rows = tile_start + lax.broadcasted_iota(jnp.int32, (tile_n, 1), 0)
    row_valid = (rows < n_rows).astype(jnp.float32)            # (T, 1)

    # ---- KLDivLoss pair (reduction='mean' over N*C), using logp directly ----
    # prob2*(logp2-logp1) + prob1*(logp1-logp2) == (prob2-prob1)*(logp2-logp1)
    kl_elt = (prob2 - prob1) * (logp2 - logp1)                 # padded classes -> 0
    kl_row = jnp.sum(kl_elt, axis=-1, keepdims=True)           # (T, 1)
    kl_acc[...] += jnp.sum(kl_row * row_valid, axis=0, keepdims=True)

    # ---- CrossEntropyLoss applied to PROBABILITIES (as the PyTorch code) ----
    # ce_row = logsumexp(prob) - prob[y].  Padded classes have prob == 0, so
    # exp(prob) == 1 there: sum over all lanes and subtract the pad count.
    exp_dtype = jnp.bfloat16 if _USE_BF16_EXP else jnp.float32
    ep1 = jnp.exp(prob1.astype(exp_dtype)).astype(jnp.float32)
    ep2 = jnp.exp(prob2.astype(exp_dtype)).astype(jnp.float32)
    pad_count = float(c_pad - num_class)
    lse1 = jnp.log(jnp.sum(ep1, axis=-1, keepdims=True) - pad_count)   # (T, 1)
    lse2 = jnp.log(jnp.sum(ep2, axis=-1, keepdims=True) - pad_count)

    lane = lax.broadcasted_iota(jnp.int32, (1, c_pad), 1)
    pick = jnp.sum(jnp.where(lane == y_col, prob1 + prob2, 0.0),
                   axis=-1, keepdims=True)                             # (T, 1)
    ce_row = (lse1 + lse2) - pick
    ce_acc[...] += jnp.sum(mask_col * ce_row, axis=0, keepdims=True)
    nt_acc[...] += jnp.sum(mask_col, axis=0, keepdims=True)

    @pl.when(step == nsteps - 1)
    def _finalize():
        # Per-core partials [kl_sum, ce_sum, n_train] in lanes 0..2 of a
        # lane-dense (1, 1, 128) output block; final combine in the wrapper.
        lane_o = lax.broadcasted_iota(jnp.int32, (1, 128), 1)
        vec = jnp.where(lane_o == 0, kl_acc[...],
              jnp.where(lane_o == 1, ce_acc[...],
              jnp.where(lane_o == 2, nt_acc[...], 0.0)))
        o_ref[...] = vec.reshape(1, 1, 128)


def classifier_forward(emb_v1, emb_v2, train_mask, y, w1, b1, w2, b2,
                       *, tile_n=512, matmul_dtype=jnp.bfloat16, num_core_split=2):
    """Wrapper: layout/padding glue in plain JAX, all compute in the kernel."""
    n, d = emb_v1.shape
    c = w1.shape[0]
    c_pad = max(128, _round_up(c, 128))
    mm = jnp.dtype(matmul_dtype)
    emb_esize = jnp.dtype(emb_v1.dtype).itemsize

    n_core = max(1, int(num_core_split))
    # Clamp the row tile to each core's share (avoid over-padding small N).
    per_core = _round_up(-(-n // n_core), 8)
    tile_n = max(8, min(_round_up(int(tile_n), 8), per_core))
    n_pad = _round_up(n, tile_n * n_core)
    tiles_per_core = n_pad // (tile_n * n_core)
    grid = (n_core, tiles_per_core)

    row_pad = n_pad - n
    emb1 = emb_v1 if row_pad == 0 else jnp.pad(emb_v1, ((0, row_pad), (0, 0)))
    emb2 = emb_v2 if row_pad == 0 else jnp.pad(emb_v2, ((0, row_pad), (0, 0)))
    # Column-oriented metadata: label pick / masking become pure elementwise ops.
    mask_col = jnp.pad(train_mask.astype(jnp.float32), (0, row_pad)).reshape(n_pad, 1)
    y_col = jnp.pad(y.astype(jnp.int32), (0, row_pad)).reshape(n_pad, 1)

    w1t = jnp.pad(w1.T.astype(mm), ((0, 0), (0, c_pad - c)))      # (D, C_pad)
    w2t = jnp.pad(w2.T.astype(mm), ((0, 0), (0, c_pad - c)))
    bias_pad = jnp.full((c_pad - c,), _NEG_BIG, jnp.float32)
    b1p = jnp.concatenate([b1.astype(jnp.float32), bias_pad]).reshape(1, c_pad)
    b2p = jnp.concatenate([b2.astype(jnp.float32), bias_pad]).reshape(1, c_pad)

    kernel = functools.partial(_classifier_loss_kernel, n_rows=n, num_class=c,
                               c_pad=c_pad, tile_n=tile_n)

    # VMEM budget: derived from the tile footprint, capped at 48 MiB so the
    # request stays comfortably inside v7x's 64 MiB physical VMEM.
    vmem_est = (2 * 2 * tile_n * d * emb_esize          # emb tiles, double-buffered
                + 2 * 2 * d * c_pad * mm.itemsize       # resident weights (2 bufs)
                + 2 * 2 * c_pad * 4                     # biases
                + 4 * (tile_n // 8) * 4096              # (T,1) metadata vreg footprint
                + 16 * tile_n * c_pad * 4               # (T,C_pad) f32 temporaries
                + 4 * 128 * 4)
    vmem_limit = int(min(48 << 20, max(32 << 20, 2 * vmem_est)))

    cost = pl.CostEstimate(
        flops=int(4 * n_pad * d * c_pad),
        transcendentals=int(4 * n_pad * c_pad),
        bytes_accessed=int(2 * n_pad * d * emb_esize + 8 * n_pad
                           + 2 * d * c_pad * mm.itemsize + 2 * 4 * c_pad
                           + n_core * 128 * 4),
    )

    L = tiles_per_core
    grid_spec = pltpu.PrefetchScalarGridSpec(
        num_scalar_prefetch=0,
        grid=grid,
        in_specs=[
            pl.BlockSpec((tile_n, d), lambda cc, j, L=L: (cc * L + j, 0)),   # emb_v1
            pl.BlockSpec((tile_n, d), lambda cc, j, L=L: (cc * L + j, 0)),   # emb_v2
            pl.BlockSpec((d, c_pad), lambda cc, j: (0, 0)),                  # w1^T (resident)
            pl.BlockSpec((1, c_pad), lambda cc, j: (0, 0)),                  # b1
            pl.BlockSpec((d, c_pad), lambda cc, j: (0, 0)),                  # w2^T (resident)
            pl.BlockSpec((1, c_pad), lambda cc, j: (0, 0)),                  # b2
            pl.BlockSpec((tile_n, 1), lambda cc, j, L=L: (cc * L + j, 0)),   # train mask
            pl.BlockSpec((tile_n, 1), lambda cc, j, L=L: (cc * L + j, 0)),   # labels
        ],
        out_specs=pl.BlockSpec((1, 1, 128), lambda cc, j: (cc, 0, 0)),
        scratch_shapes=[pltpu.VMEM((1, 1), jnp.float32)] * 3,   # kl / ce / n_train
    )

    out = pl.pallas_call(
        kernel,
        out_shape=jax.ShapeDtypeStruct((n_core, 1, 128), jnp.float32),
        grid_spec=grid_spec,
        compiler_params=pltpu.CompilerParams(
            dimension_semantics=("parallel", "arbitrary"),
            vmem_limit_bytes=vmem_limit),
        cost_estimate=cost,
    )(emb1, emb2, w1t, b1p, w2t, b2p, mask_col, y_col)

    # Final combine (exact f32 division for 1/n_train; KLDivLoss 'mean' is over N*C).
    parts = out[:, 0, :]                                  # (n_core, 128)
    kl_sum = jnp.sum(parts[:, 0])
    ce_sum = jnp.sum(parts[:, 1])
    n_train = jnp.maximum(jnp.sum(parts[:, 2]), 1.0)      # guard: no train rows -> 0
    return kl_sum * (0.5 / float(n * c)) + 0.5 * ce_sum / n_train


def _reference(emb_v1, emb_v2, train_mask, y, w1, b1, w2, b2):
    """Pure-JAX (f32) reference mirroring the PyTorch forward semantics."""
    def lin(e, w, b):
        p = e @ w.T + b
        return p - jnp.max(p, axis=-1, keepdims=True)

    pred1 = lin(emb_v1, w1, b1)
    pred2 = lin(emb_v2, w2, b2)
    logp1 = jax.nn.log_softmax(pred1, axis=-1)
    logp2 = jax.nn.log_softmax(pred2, axis=-1)
    prob1 = jnp.exp(logp1)
    prob2 = jnp.exp(logp2)

    def ce_on_probs(prob):
        lse = jax.nn.logsumexp(prob, axis=-1)
        pick = jnp.take_along_axis(prob, y[:, None], axis=-1)[:, 0]
        per_row = lse - pick
        m = train_mask.astype(jnp.float32)
        return jnp.sum(m * per_row) / jnp.sum(m)

    ce1 = ce_on_probs(prob1)
    ce2 = ce_on_probs(prob2)
    kl12 = jnp.mean(prob2 * (jnp.log(prob2) - logp1))
    kl21 = jnp.mean(prob1 * (jnp.log(prob1) - logp2))
    return 0.5 * (kl12 + kl21) + 0.5 * (ce1 + ce2)


if __name__ == "__main__":
    N, DIM_IN, NUM_CLASS = 200, 32, 16

    key = jax.random.PRNGKey(0)
    k_e1, k_e2, k_w1, k_w2, k_y, k_m = jax.random.split(key, 6)

    emb_v1 = jax.random.normal(k_e1, (N, DIM_IN), dtype=jnp.float32)
    emb_v2 = jax.random.normal(k_e2, (N, DIM_IN), dtype=jnp.float32)

    # Xavier-uniform init (gain=1): limit = sqrt(6 / (fan_in + fan_out)); bias=0.
    limit = (6.0 / (DIM_IN + NUM_CLASS)) ** 0.5
    w1 = jax.random.uniform(k_w1, (NUM_CLASS, DIM_IN), jnp.float32, -limit, limit)
    w2 = jax.random.uniform(k_w2, (NUM_CLASS, DIM_IN), jnp.float32, -limit, limit)
    b1 = jnp.zeros((NUM_CLASS,), jnp.float32)
    b2 = jnp.zeros((NUM_CLASS,), jnp.float32)

    y = jax.random.randint(k_y, (N,), 0, NUM_CLASS, dtype=jnp.int32)
    train_mask = jax.random.bernoulli(k_m, 0.5, (N,))

    # tile_n=64 -> grid (2 cores x 2 steps): exercises the parallel split,
    # multi-step accumulation, and row padding.
    loss = classifier_forward(emb_v1, emb_v2, train_mask, y, w1, b1, w2, b2,
                              tile_n=64)
    jax.block_until_ready(loss)

    ref = _reference(emb_v1, emb_v2, train_mask, y, w1, b1, w2, b2)
    # bf16 matmul inputs + bf16 CE exps vs. an f32 reference.
    assert jnp.allclose(loss, ref, atol=1e-2, rtol=1e-2), (loss, ref)

    print("KERNEL_OK")
</pallas_src>

<mosaic_0001>
module attributes {stable_mosaic.version = 11 : i64} {
  func.func @_classifier_loss_kernel(%arg0: i32, %arg1: i32, %arg2: memref<64x32xf32, #tpu.memory_space<vmem>>, %arg3: memref<64x32xf32, #tpu.memory_space<vmem>>, %arg4: memref<32x128xbf16, #tpu.memory_space<vmem>>, %arg5: memref<1x128xf32, #tpu.memory_space<vmem>>, %arg6: memref<32x128xbf16, #tpu.memory_space<vmem>>, %arg7: memref<1x128xf32, #tpu.memory_space<vmem>>, %arg8: memref<64x1xf32, #tpu.memory_space<vmem>>, %arg9: memref<64x1xi32, #tpu.memory_space<vmem>>, %arg10: memref<1x1x128xf32, #tpu.memory_space<vmem>>, %arg11: memref<1x1xf32, #tpu.memory_space<vmem>>, %arg12: memref<1x1xf32, #tpu.memory_space<vmem>>, %arg13: memref<1x1xf32, #tpu.memory_space<vmem>>) attributes {dimension_semantics = [#tpu.dimension_semantics<parallel>, #tpu.dimension_semantics<arbitrary>], iteration_bounds = array<i64: 2, 2>, scalar_prefetch = 0 : i64, scratch_operands = 3 : i64, tpu.core_type = #tpu.core_type<tc>, window_params = [{transform_indices = @transform_0, window_bounds = array<i64: 64, 32>}, {transform_indices = @transform_1, window_bounds = array<i64: 64, 32>}, {pipeline_mode = #tpu.pipeline_mode<synchronous>, transform_indices = @transform_2, window_bounds = array<i64: 32, 128>}, {pipeline_mode = #tpu.pipeline_mode<synchronous>, transform_indices = @transform_3, window_bounds = array<i64: 1, 128>}, {pipeline_mode = #tpu.pipeline_mode<synchronous>, transform_indices = @transform_4, window_bounds = array<i64: 32, 128>}, {pipeline_mode = #tpu.pipeline_mode<synchronous>, transform_indices = @transform_5, window_bounds = array<i64: 1, 128>}, {transform_indices = @transform_6, window_bounds = array<i64: 64, 1>}, {transform_indices = @transform_7, window_bounds = array<i64: 64, 1>}, {transform_indices = @transform_8, window_bounds = array<i64: 1, 1, 128>}]} {
    %c0_i32 = arith.constant 0 : i32
    %0 = arith.cmpi eq, %arg1, %c0_i32 : i32
    %1 = arith.extui %0 : i1 to i32
    %c0_i32_0 = arith.constant 0 : i32
    %2 = arith.cmpi ne, %1, %c0_i32_0 : i32
    scf.if %2 {
      %cst_46 = arith.constant 0.000000e+00 : f32
      %109 = vector.broadcast %cst_46 : f32 to vector<1x1xf32>
      %c0_47 = arith.constant 0 : index
      %c0_48 = arith.constant 0 : index
      %110 = vector.load %arg11[%c0_47, %c0_48] : memref<1x1xf32, #tpu.memory_space<vmem>>, vector<1x1xf32>
      tpu.vector_store %arg11[%c0_47, %c0_48], %109 {strides = array<i32>} : memref<1x1xf32, #tpu.memory_space<vmem>>, vector<1x1xf32>,
      %cst_49 = arith.constant 0.000000e+00 : f32
      %111 = vector.broadcast %cst_49 : f32 to vector<1x1xf32>
      %c0_50 = arith.constant 0 : index
      %c0_51 = arith.constant 0 : index
      %112 = vector.load %arg12[%c0_50, %c0_51] : memref<1x1xf32, #tpu.memory_space<vmem>>, vector<1x1xf32>
      tpu.vector_store %arg12[%c0_50, %c0_51], %111 {strides = array<i32>} : memref<1x1xf32, #tpu.memory_space<vmem>>, vector<1x1xf32>,
      %cst_52 = arith.constant 0.000000e+00 : f32
      %113 = vector.broadcast %cst_52 : f32 to vector<1x1xf32>
      %c0_53 = arith.constant 0 : index
      %c0_54 = arith.constant 0 : index
      %114 = vector.load %arg13[%c0_53, %c0_54] : memref<1x1xf32, #tpu.memory_space<vmem>>, vector<1x1xf32>
      tpu.vector_store %arg13[%c0_53, %c0_54], %113 {strides = array<i32>} : memref<1x1xf32, #tpu.memory_space<vmem>>, vector<1x1xf32>,
    } else {
    }
    %c0 = arith.constant 0 : index
    %c0_1 = arith.constant 0 : index
    %3 = vector.load %arg2[%c0, %c0_1] : memref<64x32xf32, #tpu.memory_space<vmem>>, vector<64x32xf32>
    %4 = arith.truncf %3 : vector<64x32xf32> to vector<64x32xbf16>
    %c0_2 = arith.constant 0 : index
    %c0_3 = arith.constant 0 : index
    %5 = vector.load %arg3[%c0_2, %c0_3] : memref<64x32xf32, #tpu.memory_space<vmem>>, vector<64x32xf32>
    %6 = arith.truncf %5 : vector<64x32xf32> to vector<64x32xbf16>
    %c0_4 = arith.constant 0 : index
    %c0_5 = arith.constant 0 : index
    %7 = vector.load %arg8[%c0_4, %c0_5] : memref<64x1xf32, #tpu.memory_space<vmem>>, vector<64x1xf32>
    %c0_6 = arith.constant 0 : index
    %c0_7 = arith.constant 0 : index
    %8 = vector.load %arg9[%c0_6, %c0_7] : memref<64x1xi32, #tpu.memory_space<vmem>>, vector<64x1xi32>
    %c0_8 = arith.constant 0 : index
    %c0_9 = arith.constant 0 : index
    %9 = vector.load %arg4[%c0_8, %c0_9] : memref<32x128xbf16, #tpu.memory_space<vmem>>, vector<32x128xbf16>
    %cst = arith.constant dense<0.000000e+00> : vector<64x128xf32>
    %10 = tpu.matmul %4, %9, %cst {dimension_numbers = #tpu.dot_dimension_numbers<[1], [0], [0], [1], [0, 0, 1, 1], [], []>} : vector<64x32xbf16>, vector<32x128xbf16>, vector<64x128xf32> -> vector<64x128xf32>
    %c0_10 = arith.constant 0 : index
    %c0_11 = arith.constant 0 : index
    %11 = vector.load %arg5[%c0_10, %c0_11] : memref<1x128xf32, #tpu.memory_space<vmem>>, vector<1x128xf32>
    %12 = vector.broadcast %11 : vector<1x128xf32> to vector<64x128xf32>
    %13 = arith.addf %10, %12 : vector<64x128xf32>
    %c0_12 = arith.constant 0 : index
    %c0_13 = arith.constant 0 : index
    %14 = vector.load %arg6[%c0_12, %c0_13] : memref<32x128xbf16, #tpu.memory_space<vmem>>, vector<32x128xbf16>
    %cst_14 = arith.constant dense<0.000000e+00> : vector<64x128xf32>
    %15 = tpu.matmul %6, %14, %cst_14 {dimension_numbers = #tpu.dot_dimension_numbers<[1], [0], [0], [1], [0, 0, 1, 1], [], []>} : vector<64x32xbf16>, vector<32x128xbf16>, vector<64x128xf32> -> vector<64x128xf32>
    %c0_15 = arith.constant 0 : index
    %c0_16 = arith.constant 0 : index
    %16 = vector.load %arg7[%c0_15, %c0_16] : memref<1x128xf32, #tpu.memory_space<vmem>>, vector<1x128xf32>
    %17 = vector.broadcast %16 : vector<1x128xf32> to vector<64x128xf32>
    %18 = arith.addf %15, %17 : vector<64x128xf32>
    %cst_17 = arith.constant dense<0xFF800000> : vector<64xf32>
    %19 = vector.multi_reduction <maximumf>, %13, %cst_17 [1] : vector<64x128xf32> to vector<64xf32>
    %20 = vector.shape_cast %19 : vector<64xf32> to vector<64x1xf32>
    %21 = vector.broadcast %20 : vector<64x1xf32> to vector<64x128xf32>
    %22 = arith.subf %13, %21 : vector<64x128xf32>
    %cst_18 = arith.constant dense<0xFF800000> : vector<64xf32>
    %23 = vector.multi_reduction <maximumf>, %18, %cst_18 [1] : vector<64x128xf32> to vector<64xf32>
    %24 = vector.shape_cast %23 : vector<64xf32> to vector<64x1xf32>
    %25 = vector.broadcast %24 : vector<64x1xf32> to vector<64x128xf32>
    %26 = arith.subf %18, %25 : vector<64x128xf32>
    %27 = math.exp %22 : vector<64x128xf32>
    %28 = math.exp %26 : vector<64x128xf32>
    %cst_19 = arith.constant dense<0.000000e+00> : vector<64xf32>
    %29 = vector.multi_reduction <add>, %27, %cst_19 [1] : vector<64x128xf32> to vector<64xf32>
    %30 = vector.shape_cast %29 : vector<64xf32> to vector<64x1xf32>
    %cst_20 = arith.constant dense<0.000000e+00> : vector<64xf32>
    %31 = vector.multi_reduction <add>, %28, %cst_20 [1] : vector<64x128xf32> to vector<64xf32>
    %32 = vector.shape_cast %31 : vector<64xf32> to vector<64x1xf32>
    %cst_21 = arith.constant 1.000000e+00 : f32
    %33 = vector.broadcast %cst_21 : f32 to vector<64x1xf32>
    %34 = arith.divf %33, %30 : vector<64x1xf32>
    %35 = vector.broadcast %34 : vector<64x1xf32> to vector<64x128xf32>
    %36 = arith.mulf %27, %35 : vector<64x128xf32>
    %cst_22 = arith.constant 1.000000e+00 : f32
    %37 = vector.broadcast %cst_22 : f32 to vector<64x1xf32>
    %38 = arith.divf %37, %32 : vector<64x1xf32>
    %39 = vector.broadcast %38 : vector<64x1xf32> to vector<64x128xf32>
    %40 = arith.mulf %28, %39 : vector<64x128xf32>
    %41 = math.log %30 : vector<64x1xf32>
    %42 = vector.broadcast %41 : vector<64x1xf32> to vector<64x128xf32>
    %43 = arith.subf %22, %42 : vector<64x128xf32>
    %44 = math.log %32 : vector<64x1xf32>
    %45 = vector.broadcast %44 : vector<64x1xf32> to vector<64x128xf32>
    %46 = arith.subf %26, %45 : vector<64x128xf32>
    %c2_i32 = arith.constant 2 : i32
    %47 = arith.muli %arg0, %c2_i32 : i32
    %48 = arith.addi %47, %arg1 : i32
    %c64_i32 = arith.constant 64 : i32
    %49 = arith.muli %48, %c64_i32 : i32
    %50 = tpu.iota {dimensions = array<i32: 0>} : vector<64x1xi32>
    %51 = vector.broadcast %49 : i32 to vector<64x1xi32>
    %52 = arith.addi %51, %50 : vector<64x1xi32>
    %c200_i32 = arith.constant 200 : i32
    %53 = vector.broadcast %c200_i32 : i32 to vector<64x1xi32>
    %54 = arith.cmpi slt, %52, %53 : vector<64x1xi32>
    %55 = arith.extui %54 : vector<64x1xi1> to vector<64x1xi32>
    %56 = arith.sitofp %55 : vector<64x1xi32> to vector<64x1xf32>
    %57 = arith.subf %40, %36 : vector<64x128xf32>
    %58 = arith.subf %46, %43 : vector<64x128xf32>
    %59 = arith.mulf %57, %58 : vector<64x128xf32>
    %cst_23 = arith.constant dense<0.000000e+00> : vector<64xf32>
    %60 = vector.multi_reduction <add>, %59, %cst_23 [1] : vector<64x128xf32> to vector<64xf32>
    %61 = vector.shape_cast %60 : vector<64xf32> to vector<64x1xf32>
    %c0_24 = arith.constant 0 : index
    %c0_25 = arith.constant 0 : index
    %62 = vector.load %arg11[%c0_24, %c0_25] : memref<1x1xf32, #tpu.memory_space<vmem>>, vector<1x1xf32>
    %63 = arith.mulf %61, %56 : vector<64x1xf32>
    %cst_26 = arith.constant dense<0.000000e+00> : vector<1xf32>
    %64 = vector.multi_reduction <add>, %63, %cst_26 [0] : vector<64x1xf32> to vector<1xf32>
    %65 = vector.shape_cast %64 : vector<1xf32> to vector<1x1xf32>
    %66 = arith.addf %62, %65 : vector<1x1xf32>
    %c0_27 = arith.constant 0 : index
    %c0_28 = arith.constant 0 : index
    %67 = vector.load %arg11[%c0_27, %c0_28] : memref<1x1xf32, #tpu.memory_space<vmem>>, vector<1x1xf32>
    tpu.vector_store %arg11[%c0_27, %c0_28], %66 {strides = array<i32>} : memref<1x1xf32, #tpu.memory_space<vmem>>, vector<1x1xf32>,
    %68 = arith.truncf %36 : vector<64x128xf32> to vector<64x128xbf16>
    %69 = math.exp %68 : vector<64x128xbf16>
    %70 = arith.extf %69 : vector<64x128xbf16> to vector<64x128xf32>
    %71 = arith.truncf %40 : vector<64x128xf32> to vector<64x128xbf16>
    %72 = math.exp %71 : vector<64x128xbf16>
    %73 = arith.extf %72 : vector<64x128xbf16> to vector<64x128xf32>
    %cst_29 = arith.constant dense<0.000000e+00> : vector<64xf32>
    %74 = vector.multi_reduction <add>, %70, %cst_29 [1] : vector<64x128xf32> to vector<64xf32>
    %75 = vector.shape_cast %74 : vector<64xf32> to vector<64x1xf32>
    %cst_30 = arith.constant 1.120000e+02 : f32
    %76 = vector.broadcast %cst_30 : f32 to vector<64x1xf32>
    %77 = arith.subf %75, %76 : vector<64x1xf32>
    %78 = math.log %77 : vector<64x1xf32>
    %cst_31 = arith.constant dense<0.000000e+00> : vector<64xf32>
    %79 = vector.multi_reduction <add>, %73, %cst_31 [1] : vector<64x128xf32> to vector<64xf32>
    %80 = vector.shape_cast %79 : vector<64xf32> to vector<64x1xf32>
    %cst_32 = arith.constant 1.120000e+02 : f32
    %81 = vector.broadcast %cst_32 : f32 to vector<64x1xf32>
    %82 = arith.subf %80, %81 : vector<64x1xf32>
    %83 = math.log %82 : vector<64x1xf32>
    %84 = tpu.iota {dimensions = array<i32: 1>} : vector<1x128xi32>
    %85 = vector.broadcast %84 : vector<1x128xi32> to vector<64x128xi32>
    %86 = vector.broadcast %8 : vector<64x1xi32> to vector<64x128xi32>
    %87 = arith.cmpi eq, %85, %86 : vector<64x128xi32>
    %88 = arith.addf %36, %40 : vector<64x128xf32>
    %cst_33 = arith.constant 0.000000e+00 : f32
    %89 = vector.broadcast %cst_33 : f32 to vector<64x128xf32>
    %90 = arith.select %87, %88, %89 : vector<64x128xi1>, vector<64x128xf32>
    %cst_34 = arith.constant dense<0.000000e+00> : vector<64xf32>
    %91 = vector.multi_reduction <add>, %90, %cst_34 [1] : vector<64x128xf32> to vector<64xf32>
    %92 = vector.shape_cast %91 : vector<64xf32> to vector<64x1xf32>
    %93 = arith.addf %78, %83 : vector<64x1xf32>
    %94 = arith.subf %93, %92 : vector<64x1xf32>
    %c0_35 = arith.constant 0 : index
    %c0_36 = arith.constant 0 : index
    %95 = vector.load %arg12[%c0_35, %c0_36] : memref<1x1xf32, #tpu.memory_space<vmem>>, vector<1x1xf32>
    %96 = arith.mulf %7, %94 : vector<64x1xf32>
    %cst_37 = arith.constant dense<0.000000e+00> : vector<1xf32>
    %97 = vector.multi_reduction <add>, %96, %cst_37 [0] : vector<64x1xf32> to vector<1xf32>
    %98 = vector.shape_cast %97 : vector<1xf32> to vector<1x1xf32>
    %99 = arith.addf %95, %98 : vector<1x1xf32>
    %c0_38 = arith.constant 0 : index
    %c0_39 = arith.constant 0 : index
    %100 = vector.load %arg12[%c0_38, %c0_39] : memref<1x1xf32, #tpu.memory_space<vmem>>, vector<1x1xf32>
    tpu.vector_store %arg12[%c0_38, %c0_39], %99 {strides = array<i32>} : memref<1x1xf32, #tpu.memory_space<vmem>>, vector<1x1xf32>,
    %c0_40 = arith.constant 0 : index
    %c0_41 = arith.constant 0 : index
    %101 = vector.load %arg13[%c0_40, %c0_41] : memref<1x1xf32, #tpu.memory_space<vmem>>, vector<1x1xf32>
    %cst_42 = arith.constant dense<0.000000e+00> : vector<1xf32>
    %102 = vector.multi_reduction <add>, %7, %cst_42 [0] : vector<64x1xf32> to vector<1xf32>
    %103 = vector.shape_cast %102 : vector<1xf32> to vector<1x1xf32>
    %104 = arith.addf %101, %103 : vector<1x1xf32>
    %c0_43 = arith.constant 0 : index
    %c0_44 = arith.constant 0 : index
    %105 = vector.load %arg13[%c0_43, %c0_44] : memref<1x1xf32, #tpu.memory_space<vmem>>, vector<1x1xf32>
    tpu.vector_store %arg13[%c0_43, %c0_44], %104 {strides = array<i32>} : memref<1x1xf32, #tpu.memory_space<vmem>>, vector<1x1xf32>,
    %c1_i32 = arith.constant 1 : i32
    %106 = arith.cmpi eq, %arg1, %c1_i32 : i32
    %107 = arith.extui %106 : i1 to i32
    %c0_i32_45 = arith.constant 0 : i32
    %108 = arith.cmpi ne, %107, %c0_i32_45 : i32
    scf.if %108 {
      %109 = tpu.iota {dimensions = array<i32: 1>} : vector<1x128xi32>
      %c0_i32_46 = arith.constant 0 : i32
      %110 = vector.broadcast %c0_i32_46 : i32 to vector<1x128xi32>
      %111 = arith.cmpi eq, %109, %110 : vector<1x128xi32>
      %c0_47 = arith.constant 0 : index
      %c0_48 = arith.constant 0 : index
      %112 = vector.load %arg11[%c0_47, %c0_48] : memref<1x1xf32, #tpu.memory_space<vmem>>, vector<1x1xf32>
      %c1_i32_49 = arith.constant 1 : i32
      %113 = vector.broadcast %c1_i32_49 : i32 to vector<1x128xi32>
      %114 = arith.cmpi eq, %109, %113 : vector<1x128xi32>
      %c0_50 = arith.constant 0 : index
      %c0_51 = arith.constant 0 : index
      %115 = vector.load %arg12[%c0_50, %c0_51] : memref<1x1xf32, #tpu.memory_space<vmem>>, vector<1x1xf32>
      %c2_i32_52 = arith.constant 2 : i32
      %116 = vector.broadcast %c2_i32_52 : i32 to vector<1x128xi32>
      %117 = arith.cmpi eq, %109, %116 : vector<1x128xi32>
      %c0_53 = arith.constant 0 : index
      %c0_54 = arith.constant 0 : index
      %118 = vector.load %arg13[%c0_53, %c0_54] : memref<1x1xf32, #tpu.memory_space<vmem>>, vector<1x1xf32>
      %cst_55 = arith.constant 0.000000e+00 : f32
      %119 = vector.shape_cast %118 : vector<1x1xf32> to vector<1x1xf32>
      %120 = vector.broadcast %119 : vector<1x1xf32> to vector<1x128xf32>
      %121 = vector.broadcast %cst_55 : f32 to vector<1x128xf32>
      %122 = arith.select %117, %120, %121 : vector<1x128xi1>, vector<1x128xf32>
      %123 = vector.shape_cast %115 : vector<1x1xf32> to vector<1x1xf32>
      %124 = vector.broadcast %123 : vector<1x1xf32> to vector<1x128xf32>
      %125 = arith.select %114, %124, %122 : vector<1x128xi1>, vector<1x128xf32>
      %126 = vector.shape_cast %112 : vector<1x1xf32> to vector<1x1xf32>
      %127 = vector.broadcast %126 : vector<1x1xf32> to vector<1x128xf32>
      %128 = arith.select %111, %127, %125 : vector<1x128xi1>, vector<1x128xf32>
      %129 = vector.shape_cast %128 : vector<1x128xf32> to vector<1x1x128xf32>
      %c0_56 = arith.constant 0 : index
      %c0_57 = arith.constant 0 : index
      %c0_58 = arith.constant 0 : index
      %130 = vector.load %arg10[%c0_56, %c0_57, %c0_58] : memref<1x1x128xf32, #tpu.memory_space<vmem>>, vector<1x1x128xf32>
      tpu.vector_store %arg10[%c0_56, %c0_57, %c0_58], %129 {strides = array<i32>} : memref<1x1x128xf32, #tpu.memory_space<vmem>>, vector<1x1x128xf32>,
    } else {
    }
    return
  }
  func.func @transform_0(%arg0: i32, %arg1: i32) -> (i32, i32) {
    %c2_i32 = arith.constant 2 : i32
    %0 = arith.muli %arg0, %c2_i32 : i32
    %1 = arith.addi %0, %arg1 : i32
    %c0_i32 = arith.constant 0 : i32
    %c0_i32_0 = arith.constant 0 : i32
    return %1, %c0_i32 : i32, i32
  }
  func.func @transform_1(%arg0: i32, %arg1: i32) -> (i32, i32) {
    %c2_i32 = arith.constant 2 : i32
    %0 = arith.muli %arg0, %c2_i32 : i32
    %1 = arith.addi %0, %arg1 : i32
    %c0_i32 = arith.constant 0 : i32
    %c0_i32_0 = arith.constant 0 : i32
    return %1, %c0_i32 : i32, i32
  }
  func.func @transform_2(%arg0: i32, %arg1: i32) -> (i32, i32) {
    %c0_i32 = arith.constant 0 : i32
    %c0_i32_0 = arith.constant 0 : i32
    %c0_i32_1 = arith.constant 0 : i32
    return %c0_i32, %c0_i32_0 : i32, i32
  }
  func.func @transform_3(%arg0: i32, %arg1: i32) -> (i32, i32) {
    %c0_i32 = arith.constant 0 : i32
    %c0_i32_0 = arith.constant 0 : i32
    %c0_i32_1 = arith.constant 0 : i32
    return %c0_i32, %c0_i32_0 : i32, i32
  }
  func.func @transform_4(%arg0: i32, %arg1: i32) -> (i32, i32) {
    %c0_i32 = arith.constant 0 : i32
    %c0_i32_0 = arith.constant 0 : i32
    %c0_i32_1 = arith.constant 0 : i32
    return %c0_i32, %c0_i32_0 : i32, i32
  }
  func.func @transform_5(%arg0: i32, %arg1: i32) -> (i32, i32) {
    %c0_i32 = arith.constant 0 : i32
    %c0_i32_0 = arith.constant 0 : i32
    %c0_i32_1 = arith.constant 0 : i32
    return %c0_i32, %c0_i32_0 : i32, i32
  }
  func.func @transform_6(%arg0: i32, %arg1: i32) -> (i32, i32) {
    %c2_i32 = arith.constant 2 : i32
    %0 = arith.muli %arg0, %c2_i32 : i32
    %1 = arith.addi %0, %arg1 : i32
    %c0_i32 = arith.constant 0 : i32
    %c0_i32_0 = arith.constant 0 : i32
    return %1, %c0_i32 : i32, i32
  }
  func.func @transform_7(%arg0: i32, %arg1: i32) -> (i32, i32) {
    %c2_i32 = arith.constant 2 : i32
    %0 = arith.muli %arg0, %c2_i32 : i32
    %1 = arith.addi %0, %arg1 : i32
    %c0_i32 = arith.constant 0 : i32
    %c0_i32_0 = arith.constant 0 : i32
    return %1, %c0_i32 : i32, i32
  }
  func.func @transform_8(%arg0: i32, %arg1: i32) -> (i32, i32, i32) {
    %c0_i32 = arith.constant 0 : i32
    %c0_i32_0 = arith.constant 0 : i32
    %c0_i32_1 = arith.constant 0 : i32
    return %arg0, %c0_i32, %c0_i32_0 : i32, i32, i32
  }
}

</mosaic_0001>

<bundles_post_ra>
// kernel: tpu_custom_call.1
= control target key start
LH: loop header
LB: loop body
LE: loop exit
PB: predicated region body
PF: predicated region fallthrough
CT: control target
= control target key end

     0   :  { %13 = vsyncpa [#allocation6], 0  ;;  %s2458_s0 = inlined_call_operand.vmem [shape: f32[256,32], index: 0, kind: input, shape index: {}]   ;;  %s2459_s1 = inlined_call_operand.vmem [shape: f32[256,32], index: 1, kind: input, shape index: {}]   ;;  %s2460_s2 = inlined_call_operand.vmem [shape: bf16[32,128], index: 2, kind: input, shape index: {}]   ;;  %s2461_s3 = inlined_call_operand.vmem [shape: f32[1,128], index: 3, kind: input, shape index: {}]   ;;  %s2462_s4 = inlined_call_operand.vmem [shape: bf16[32,128], index: 4, kind: input, shape index: {}]   ;;  %s2463_s5 = inlined_call_operand.vmem [shape: f32[1,128], index: 5, kind: input, shape index: {}]   ;;  %s2464_s6 = inlined_call_operand.vmem [shape: f32[256,1], index: 6, kind: input, shape index: {}]   ;;  %s2465_s7 = inlined_call_operand.vmem [shape: s32[256,1], index: 7, kind: input, shape index: {}]   ;;  %s2466_s8 = inlined_call_operand.hbm [shape: f32[2,1,128], index: 8, kind: output, shape index: {}]  }
   0x1   :  { %15 = vsyncpa [#allocation6 + $0x1], 0  ;;  %s1909_s27 = smov 0   ;;  %s1911_s28 = smov 0  }
   0x2   :  { %s1913_s29 = smov 0   ;;  %s1915_s30 = smov 0  }
   0x3   :  { %s1917_s9 = smov 0   ;;  %s1919_s10 = smov 0  }
   0x4   :  { %s1921_s11 = smov 0   ;;  %s1923_s12 = smov 0  }
   0x5 LB: > { %2472 = sst [smem:[#allocation8_spill]] %s1837_s29  ;;  %s1430_s13 = sadd.s32 4294967295, %s1857_s12   ;;  %s1857_s12 = sphi %s1923_s12, %s21_s12   ;;  %s1853_s11 = sphi %s1921_s11, %s2489_s11   ;;  %s1849_s10 = sphi %s1919_s10, %s2488_s10   ;;  %s1845_s9 = sphi %s1917_s9, %s2487_s9   ;;  %s1841_s30 = sphi %s1915_s30, %s2486_s30   ;;  %s1837_s29 = sphi %s1913_s29, %s2485_s29   ;;  %s1833_s28 = sphi %s1911_s28, %s2491_s28   ;;  %s1829_s27 = sphi %s1909_s27, %s2490_s27  }
   0x6   : > { %2473 = sst [smem:[#allocation9_spill]] %s1849_s10  ;;  %s1431_s14 = sadd.s32 4294967294, %s1857_s12  }
   0x7   : > { %2474 = sst [smem:[#allocation10_spill]] %s1853_s11  ;;  %s30_s15 = sadd.s32 1, %s1849_s10 }
   0x8   : > { %p31_p0 = scmp.ge.s32.totalorder %s30_s15, 2  ;;  %s33_s16 = sadd.s32 1, %s1853_s11 }
   0x9   : > { %p254_p1 = scmp.ne.s32.totalorder %s1837_s29, %s1833_s28  ;;  %p255_p2 = scmp.eq.s32.totalorder %s1430_s13, 3 }
   0xa   : > { %s2493_s15 = smov (%p31_p0, %s30_s15), 0  ;;  %s2495_s16 = smov (!%p31_p0, %s33_s16), %s1853_s11 }
   0xb   : > { %2475 = sst [smem:[#allocation11_spill]] %s2493_s15  ;;  %p1958_p3 = por %p255_p2, %p254_p1 }
   0xc   : > { %p260_p4 = scmp.ne.s32.totalorder %s1833_s28, %s1829_s27  ;;  %p35_p5 = scmp.ge.s32.totalorder %s2495_s16, 2 }
   0xd   : > { %p261_p6 = scmp.eq.s32.totalorder %s1431_s14, 3  ;;  %p1442_p7 = scmp.ge.s32.totalorder %s1857_s12, 1 }
   0xe   : > { %p343_p8 = scmp.lt.s32.totalorder %s1857_s12, 5  ;;  %s2497_s16 = smov (%p35_p5, %s2495_s16), 0 }
   0xf   : > { %2477 = sst [smem:[#allocation12_spill]] %s2497_s16  ;;  %p1968_p9 = por %p261_p6, %p260_p4 }
  0x10   : > { %p344_p10 = pnand %p1442_p7, %p343_p8  ;;  %s241_s19 = ssub.s32 %s1853_s11, %s2497_s16 }
  0x11   : > { %s2478_s18 = scalar_select %p1968_p9, 1, 0 }
  0x12   : > { %s244_s20 = sadd.s32 1, %s1837_s29  ;;  %p242_p11 = scmp.eq.s32.totalorder %s241_s19, 0 }
  0x13   : > { %2479 = sst [smem:[#allocation13_spill]] %s2478_s18  ;;  %347 = sbr.rel (%p344_p10) target bundleno = 1027 (0x403), region = 52 }
  0x14   : > { %s1976_s21 = scalar_select %p242_p11, %s1837_s29, %s244_s20  }
  0x15   : > { %s1443_s23 = sshll.u32 (!%p344_p10), %s1845_s9, 1  ;;  %p1455_p13 = scmp.ne.s32.totalorder (!%p344_p10), %s1841_s30, 0 }
  0x16   : > { %2480 = sst [smem:[#allocation14_spill]] %s1976_s21  ;;  %s1981_s24 = sadd.s32 (!%p344_p10), %s1841_s30, %s1443_s23 }
  0x17   : > { %s1444_s25 = sshll.u32 (!%p344_p10), %s1981_s24, 3 }
  0x18   : > { %p402_p12 = scmp.lt.s32.totalorder (!%p344_p10), %s1444_s25, 31 }
  0x1a   : > { %s2499_s25 = smov (!%p402_p12, %s1444_s25), 31  ;;  %443 = sbr.rel (%p1455_p13) target bundleno = 33 (0x21), region = 56 }
  0x1b   : > { %s1445_s26 = sshll.u32 %s2499_s25, 3  ;;  %s2481_s25 = sand.u32 1, %s1833_s28   ;;  %vm444_vm0 = vcmask (!%p1455_p13), 0   ;;  %v1859_v0 = vmov (!%p1455_p13), 0.0  }
  0x1c   : > { %s1987_s19 = scalar_lea.vmem %s2458_s0, %s1445_s26  ;;  %s1992_s15 = scalar_lea.vmem %s2459_s1, %s1445_s26  ;;  %445 = vst.msk [vmem:[#allocation2] sm:$0x1] (!%p1455_p13), %vm444_vm0, %v1859_v0  ;;  %446 = vst.msk [vmem:[#allocation3] sm:$0x1] (!%p1455_p13), %vm444_vm0, %v1859_v0 }
  0x1d   : > { %s1997_s23 = scalar_lea.vmem %s2464_s6, %s1445_s26  ;;  %s2002_s29 = scalar_lea.vmem %s2465_s7, %s1445_s26  ;;  %447 = vst.msk [vmem:[#allocation4] sm:$0x1] (!%p1455_p13), %vm444_vm0, %v1859_v0 }
  0x1e   : > { %s2006_s18 = scalar_lea.vmem [#allocation5], %s2481_s25 }
  0x21 PF: > { %v1613_v1 = vld [vmem:[%s2460_s2] sm:$0xff]   ;;  %v1615_v3 = vld [vmem:[%s2460_s2 + $0x8] sm:$0xff]   ;;  %vm511_vm1 = vcmask 261120   ;;  %v450_v10 = vld [vmem:[%s1987_s19 + $0x10] sm:$0xff]  ;;  %v1860_v63 = vmov 0   ;;  %vm1226_vm10 = vcmask 7168  }
  0x22   : > { %v1614_v2 = vld [vmem:[%s2462_s4] sm:$0xff]   ;;  %1512 = vmatprep.subr.bf16.mxu0 %v1613_v1  ;;  %v1616_v4 = vld [vmem:[%s2462_s4 + $0x8] sm:$0xff]   ;;  %v451_v11 = vld [vmem:[%s1987_s19 + $0x18] sm:$0xff]  ;;  %1612 = vset.pattern.permute.xlu1 %v1860_v63  ;;  %vm1005_vm11 = vcmask 0   ;;  %p1496_p0 = scmp.ne.s32.totalorder %s1841_s30, 1 }
  0x23   : > { %1524 = vmatprep.subr.bf16.mxu1 %v1614_v2  ;;  %1513 = vmatpush3.bf16.msra.mxu0 %v1613_v1  ;;  %v448_v5 = vld [vmem:[%s1987_s19] sm:$0xff]  ;;  %v449_v6 = vld [vmem:[%s1987_s19 + $0x8] sm:$0xff]  ;;  %v457_v13 = vpack.c.bf16 %v451_v11, %v450_v10  ;;  %v462_v14 = vld [vmem:[%s1992_s15 + $0x10] sm:$0xff] }
  0x24   : > { %1525 = vmatpush3.bf16.msra.mxu1 %v1614_v2  ;;  %1514 = vmatprep.subr.bf16.mxu0 %v1615_v3  ;;  %v460_v7 = vld [vmem:[%s1992_s15] sm:$0xff]  ;;  %v456_v8 = vpack.c.bf16 %v449_v6, %v448_v5  ;;  %v461_v9 = vld [vmem:[%s1992_s15 + $0x8] sm:$0xff]  ;;  %v463_v15 = vld [vmem:[%s1992_s15 + $0x18] sm:$0xff] }
  0x25   : > { %1526 = vmatprep.subr.bf16.mxu1 %v1616_v4  ;;  %v468_v12 = vpack.c.bf16 %v461_v9, %v460_v7  ;;  %v452_v16 = vld [vmem:[%s1987_s19 + $0x20] sm:$0xff]  ;;  %v469_v17 = vpack.c.bf16 %v463_v15, %v462_v14  ;;  %v453_v18 = vld [vmem:[%s1987_s19 + $0x28] sm:$0xff]  ;;  %v454_v23 = vld [vmem:[%s1987_s19 + $0x30] sm:$0xff]  ;;  %1611 = vset.pattern.permute.xlu0 %v1860_v63 }
  0x26   : > { %1516 = vmatprep.mubr.msk.bf16.mxu0 %vm511_vm1, %v456_v8  ;;  %v458_v19 = vpack.c.bf16 %v453_v18, %v452_v16  ;;  %v464_v20 = vld [vmem:[%s1992_s15 + $0x20] sm:$0xff]  ;;  %v465_v21 = vld [vmem:[%s1992_s15 + $0x28] sm:$0xff]  ;;  %v455_v24 = vld [vmem:[%s1987_s19 + $0x38] sm:$0xff] }
  0x27   : > { %1515 = vmatpush3.bf16.msra.mxu0 %v1615_v3  ;;  %1528 = vmatprep.mubr.msk.bf16.mxu1 %vm511_vm1, %v468_v12  ;;  %v470_v22 = vpack.c.bf16 %v465_v21, %v464_v20  ;;  %v466_v25 = vld [vmem:[%s1992_s15 + $0x30] sm:$0xff]  ;;  %v467_v26 = vld [vmem:[%s1992_s15 + $0x38] sm:$0xff]  ;;  %v459_v27 = vpack.c.bf16 %v455_v24, %v454_v23  ;;  %v1456_v29 = vld [vmem:[%s2461_s3] ss:$0 sm:$0xff] }
  0x28   : > { %1527 = vmatpush3.bf16.msra.mxu1 %v1616_v4  ;;  %v471_v28 = vpack.c.bf16 %v467_v26, %v466_v25  ;;  %v1463_v31 = vld [vmem:[%s2463_s5] ss:$0 sm:$0xff] }
  0x2a   : > { %1517 = vmatmul.mubr.msk.bf16.vlgmr.msra.gmra.mrb[0].mxu0 %vm511_vm1, %v457_v13 }
  0x2b   : > { %1529 = vmatmul.mubr.msk.bf16.vlgmr.msra.gmra.mrb[0].mxu1 %vm511_vm1, %v469_v17  ;;  %1520 = vmatprep.mubr.msk.bf16.mxu0 %vm511_vm1, %v458_v19 }
  0x2c   : > { %1532 = vmatprep.mubr.msk.bf16.mxu1 %vm511_vm1, %v470_v22 }
  0x32   : > { %1521 = vmatmul.mubr.msk.bf16.gmra.mrb[4].mxu0 %vm511_vm1, %v459_v27 }
  0x33   : > { %1533 = vmatmul.mubr.msk.bf16.gmra.mrb[4].mxu1 %vm511_vm1, %v471_v28 }
  0xfd   : > { %v1518_v30 = vpop.f32.mrb[0].mxu0 }
  0xfe   : > { %v567_v32 = vadd.f32 %v1518_v30, %v1456_v29  ;;  %v1530_v33 = vpop.f32.mrb[0].mxu1  ;;  %v558_v34 = vpop.f32.mrb[1].mxu0 }
  0xff   : > { %v658_v35 = vpop.f32.mrb[1].mxu1  ;;  %v1519_v36 = vpop.f32.mrb[2].mxu0  ;;  %v667_v41 = vadd.f32 %v1530_v33, %v1463_v31  ;;  %v559_v44 = vadd.f32 %v1456_v29, %v558_v34 }
 0x100   : > { %v659_v37 = vadd.f32 %v1463_v31, %v658_v35  ;;  %v1531_v38 = vpop.f32.mrb[2].mxu1  ;;  %693 = vmax.xlane.f32.xlu0 %v567_v32  ;;  %v561_v39 = vpop.f32.mrb[3].mxu0  ;;  %v570_v42 = vadd.f32 %v1519_v36, %v1456_v29 }
 0x101   : > { %v661_v40 = vpop.f32.mrb[3].mxu1  ;;  %v670_v49 = vadd.f32 %v1531_v38, %v1463_v31  ;;  %v562_v53 = vadd.f32 %v1456_v29, %v561_v39 }
 0x102   : > { %713 = vmax.xlane.f32.xlu1 %v659_v37  ;;  %v662_v54 = vadd.f32 %v1463_v31, %v661_v40 }
 0x104   : > { %717 = vmax.xlane.f32.xlu0 %v667_v41 }
 0x105   : > { %v1522_v43 = vpop.f32.mrb[4].mxu0 }
 0x106   : > { %695 = vmax.xlane.f32.xlu1 %v570_v42  ;;  %v574_v45 = vpop.f32.mrb[5].mxu0  ;;  %v1534_v46 = vpop.f32.mrb[4].mxu1  ;;  %v583_v55 = vadd.f32 %v1522_v43, %v1456_v29 }
 0x107   : > { %v1523_v47 = vpop.f32.mrb[6].mxu0  ;;  %v674_v48 = vpop.f32.mrb[5].mxu1  ;;  %v2053_v57 = vadd.f32 %v1456_v29, %v574_v45  ;;  %v683_v61 = vadd.f32 %v1534_v46, %v1463_v31 }
 0x108   : > { %689 = vmax.xlane.f32.xlu0 %v559_v44  ;;  %v577_v50 = vpop.f32.mrb[7].mxu0  ;;  %v1535_v51 = vpop.f32.mrb[6].mxu1  ;;  %v2051_v56 = vadd.f32 %v1523_v47, %v1456_v29  ;;  %v2058_v59 = vadd.f32 %v1463_v31, %v674_v48  ;;  %v481_v47 = vld [vmem:[%s2002_s29 + $0x8] sm:$0xff] }
 0x109   : > { %v677_v52 = vpop.f32.mrb[7].mxu1  ;;  %v2056_v58 = vadd.f32 %v1456_v29, %v577_v50  ;;  %v2065_v62 = vadd.f32 %v1535_v51, %v1463_v31 }
 0x10a   : > { %719 = vmax.xlane.f32.xlu1 %v670_v49  ;;  %v2062_v60 = vadd.f32 %v1463_v31, %v677_v52 }
 0x10c   : > { %691 = vmax.xlane.f32.xlu0 %v562_v53 }
 0x10e   : > { %715 = vmax.xlane.f32.xlu1 %v662_v54 }
 0x110   : > { %701 = vmax.xlane.f32.xlu0 %v583_v55 }
 0x112   : > { %703 = vmax.xlane.f32.xlu1 %v2051_v56 }
 0x114   : > { %697 = vmax.xlane.f32.xlu0 %v2053_v57 }
 0x116   : > { %699 = vmax.xlane.f32.xlu1 %v2056_v58 }
 0x118   : > { %721 = vmax.xlane.f32.xlu0 %v2058_v59 }
 0x11a   : > { %723 = vmax.xlane.f32.xlu1 %v2062_v60 }
 0x11c   : > { %725 = vmax.xlane.f32.xlu0 %v683_v61 }
 0x11e   : > { %727 = vmax.xlane.f32.xlu1 %v2065_v62 }
 0x18d   : > { %v694_v0 = vpop.xlane.xlu0 %693 }
 0x18e   : > { %v2069_v1 = vsub.f32 %v567_v32, %v694_v0 }
 0x18f   : > { %v714_v2 = vpop.xlane.xlu1 %713 }
 0x190   : > { %v741_v3 = vmul.f32 1.442695, %v2069_v1  ;;  %v2077_v9 = vsub.f32 %v659_v37, %v714_v2 }
 0x191   : > { %v718_v4 = vpop.xlane.xlu0 %717 }
 0x192   : > { %1617 = vpow2.f32 %v741_v3  ;;  %v2072_v5 = vsub.f32 %v667_v41, %v718_v4  ;;  %v753_v16 = vmul.f32 1.442695, %v2077_v9  ;;  %v483_v4 = vld [vmem:[%s2002_s29 + $0x18] sm:$0xff] }
 0x193   : > { %v696_v6 = vpop.xlane.xlu1 %695 }
 0x194   : > { %v757_v7 = vmul.f32 1.442695, %v2072_v5  ;;  %v2075_v8 = vsub.f32 %v570_v42, %v696_v6  ;;  %v484_v6 = vld [vmem:[%s2002_s29 + $0x20] sm:$0xff] }
 0x195   : > { %v690_v10 = vpop.xlane.xlu0 %689 }
 0x196   : > { %1619 = vpow2.f32 %v757_v7  ;;  %v743_v11 = vmul.f32 1.442695, %v2075_v8  ;;  %v2080_v12 = vsub.f32 %v559_v44, %v690_v10  ;;  %v485_v7 = vld [vmem:[%s2002_s29 + $0x28] sm:$0xff]  ;;  %v486_v10 = vld [vmem:[%s2002_s29 + $0x30] sm:$0xff] }
 0x197   : > { %v720_v13 = vpop.xlane.xlu1 %719 }
 0x198   : > { %1621 = vpow2.f32 %v743_v11  ;;  %v737_v14 = vmul.f32 1.442695, %v2080_v12  ;;  %v2083_v15 = vsub.f32 %v670_v49, %v720_v13  ;;  %v482_v49 = vld [vmem:[%s2002_s29 + $0x10] sm:$0xff]  ;;  %v487_v11 = vld [vmem:[%s2002_s29 + $0x38] sm:$0xff] }
 0x199   : > { %v692_v17 = vpop.xlane.xlu0 %691 }
 0x19a   : > { %1623 = vpow2.f32 %v737_v14  ;;  %v759_v18 = vmul.f32 1.442695, %v2083_v15  ;;  %v2087_v19 = vsub.f32 %v562_v53, %v692_v17  ;;  %v480_v53 = vld [vmem:[%s2002_s29] sm:$0xff]  ;;  %s1471_s29 = sshll.u32 %s1981_s24, 6 }
 0x19b   : > { %v716_v20 = vpop.xlane.xlu1 %715 }
 0x19c   : > { %v2089_v21 = vpop.eup %1617  ;;  %1625 = vpow2.f32 %v759_v18  ;;  %v739_v22 = vmul.f32 1.442695, %v2087_v19  ;;  %v2092_v23 = vsub.f32 %v662_v54, %v716_v20 }
 0x19d   : > { %1627 = vpow2.f32 %v753_v16  ;;  %773 = vadd.xlane.f32.xlu0 %v2089_v21  ;;  %v702_v24 = vpop.xlane.xlu0 %701 }
 0x19e   : > { %1629 = vpow2.f32 %v739_v22  ;;  %v2095_v25 = vsub.f32 %v583_v55, %v702_v24  ;;  %v755_v27 = vmul.f32 1.442695, %v2092_v23 }
 0x19f   : > { %v704_v50 = vpop.xlane.xlu1 %703 }
 0x1a0   : > { %v2097_v26 = vpop.eup %1619  ;;  %v749_v28 = vmul.f32 1.442695, %v2095_v25  ;;  %v2147_v54 = vsub.f32 %v2051_v56, %v704_v50 }
 0x1a1   : > { %789 = vadd.xlane.f32.xlu0 %v2097_v26  ;;  %v698_v29 = vpop.xlane.xlu0 %697 }
 0x1a2   : > { %v2102_v30 = vpop.eup %1621  ;;  %1631 = vpow2.f32 %v749_v28  ;;  %v2117_v37 = vsub.f32 %v2053_v57, %v698_v29  ;;  %v751_v57 = vmul.f32 1.442695, %v2147_v54 }
 0x1a3   : > { %775 = vadd.xlane.f32.xlu1 %v2102_v30  ;;  %1633 = vpow2.f32 %v755_v27  ;;  %v700_v51 = vpop.xlane.xlu1 %699 }
 0x1a4   : > { %v2105_v31 = vpop.eup %1623  ;;  %v745_v42 = vmul.f32 1.442695, %v2117_v37 }
 0x1a5   : > { %769 = vadd.xlane.f32.xlu0 %v2105_v31  ;;  %v722_v32 = vpop.xlane.xlu0 %721 }
 0x1a6   : > { %v2108_v33 = vpop.eup %1625  ;;  %v2130_v43 = vsub.f32 %v2058_v59, %v722_v32 }
 0x1a7   : > { %v2110_v34 = vpop.eup %1627  ;;  %791 = vadd.xlane.f32.xlu1 %v2108_v33  ;;  %v724_v52 = vpop.xlane.xlu1 %723 }
 0x1a8   : > { %v2113_v35 = vpop.eup %1629  ;;  %v761_v44 = vmul.f32 1.442695, %v2130_v43  ;;  %v2159_v56 = vsub.f32 %v2062_v60, %v724_v52 }
 0x1a9   : > { %785 = vadd.xlane.f32.xlu0 %v2110_v34  ;;  %v726_v36 = vpop.xlane.xlu0 %725 }
 0x1aa   : > { %v2119_v38 = vsub.f32 %v683_v61, %v726_v36  ;;  %v2154_v61 = vsub.f32 %v2056_v58, %v700_v51  ;;  %v763_v2 = vmul.f32 1.442695, %v2159_v56  ;;  %v900_v51 = vlaneseq }
 0x1ab   : > { %771 = vadd.xlane.f32.xlu1 %v2113_v35  ;;  %v728_v55 = vpop.xlane.xlu1 %727 }
 0x1ac   : > { %v2122_v39 = vpop.eup %1631  ;;  %v765_v40 = vmul.f32 1.442695, %v2119_v38  ;;  %v2151_v59 = vsub.f32 %v2065_v62, %v728_v55  ;;  %v747_v0 = vmul.f32 1.442695, %v2154_v61 }
 0x1ad   : > { %781 = vadd.xlane.f32.xlu0 %v2122_v39  ;;  %v2126_v41 = vpop.eup %1633 }
 0x1ae   : > { %1635 = vpow2.f32 %v765_v40  ;;  %v767_v63 = vmul.f32 1.442695, %v2151_v59 }
 0x1af   : > { %787 = vadd.xlane.f32.xlu1 %v2126_v41  ;;  %1637 = vpow2.f32 %v745_v42 }
 0x1b0   : > { %1639 = vpow2.f32 %v761_v44 }
 0x1b1   : > { %1641 = vpow2.f32 %v751_v57 }
 0x1b2   : > { %1643 = vpow2.f32 %v767_v63 }
 0x1b3   : > { %1645 = vpow2.f32 %v747_v0 }
 0x1b4   : > { %1647 = vpow2.f32 %v763_v2 }
 0x1b8   : > { %v2134_v45 = vpop.eup %1635 }
 0x1b9   : > { %797 = vadd.xlane.f32.xlu0 %v2134_v45  ;;  %v2137_v46 = vpop.eup %1637 }
 0x1ba   : > { %v2141_v48 = vpop.eup %1639 }
 0x1bb   : > { %v2162_v62 = vpop.eup %1641 }
 0x1bc   : > { %v2165_v58 = vpop.eup %1643 }
 0x1bd   : > { %777 = vadd.xlane.f32.xlu0 %v2137_v46  ;;  %v2168_v3 = vpop.eup %1645 }
 0x1be   : > { %v2171_v60 = vpop.eup %1647 }
 0x1c0   : > { %1141 = vperm.xlu1 %1612, %v481_v47  }
 0x1c1   : > { %793 = vadd.xlane.f32.xlu0 %v2141_v48 }
 0x1c4   : > { %1144 = vperm.xlu1 %1612, %v482_v49  }
 0x1d7   : > { %1138 = vperm.xlu0 %1611, %v480_v53  }
 0x1e8   : > { %783 = vadd.xlane.f32.xlu1 %v2162_v62 }
 0x1ec   : > { %799 = vadd.xlane.f32.xlu1 %v2165_v58 }
 0x1f0   : > { %779 = vadd.xlane.f32.xlu1 %v2168_v3 }
 0x1f4   : > { %795 = vadd.xlane.f32.xlu1 %v2171_v60 }
 0x205   : > { %1147 = vperm.xlu1 %1612, %v483_v4  }
 0x209   : > { %1150 = vperm.xlu1 %1612, %v484_v6  }
 0x20d   : > { %1153 = vperm.xlu1 %1612, %v485_v7  }
 0x211   : > { %1156 = vperm.xlu1 %1612, %v486_v10  }
 0x215   : > { %1159 = vperm.xlu1 %1612, %v487_v11   ;;  %v2188_v11 = vand.u32 127, %v900_v51 }
 0x22a   : > { %v774_v13 = vpop.xlane.xlu0 %773 }
 0x22b   : > { %1649 = vlog2.f32 %v774_v13 }
 0x22c   : > { %1651 = vrcp.f32 %v774_v13 }
 0x22e   : > { %v790_v14 = vpop.xlane.xlu0 %789 }
 0x22f   : > { %1653 = vrcp.f32 %v790_v14 }
 0x230   : > { %1655 = vlog2.f32 %v790_v14  ;;  %v776_v16 = vpop.xlane.xlu1 %775 }
 0x231   : > { %1657 = vrcp.f32 %v776_v16 }
 0x232   : > { %1659 = vlog2.f32 %v776_v16  ;;  %v770_v17 = vpop.xlane.xlu0 %769 }
 0x233   : > { %1661 = vrcp.f32 %v770_v17 }
 0x234   : > { %v792_v18 = vpop.xlane.xlu1 %791 }
 0x235   : > { %1663 = vrcp.f32 %v792_v18  ;;  %v1650_v20 = vpop.eup %1649 }
 0x236   : > { %1665 = vlog2.f32 %v792_v18  ;;  %v786_v22 = vpop.xlane.xlu0 %785  ;;  %v1652_v24 = vpop.eup %1651  ;;  %v854_v29 = vmul.f32 0.6931472, %v1650_v20 }
 0x237   : > { %1667 = vlog2.f32 %v770_v17  ;;  %v819_v36 = vmul.f32 %v1652_v24, %v2089_v21 }
 0x238   : > { %1669 = vlog2.f32 %v786_v22  ;;  %v772_v27 = vpop.xlane.xlu1 %771  ;;  %v867_v52 = vsub.f32 %v2069_v1, %v854_v29 }
 0x239   : > { %v1654_v28 = vpop.eup %1653  ;;  %1671 = vrcp.f32 %v772_v27 }
 0x23a   : > { %v1656_v32 = vpop.eup %1655  ;;  %1673 = vlog2.f32 %v772_v27  ;;  %v843_v40 = vmul.f32 %v1654_v28, %v2097_v26  ;;  %v2184_v0 = vpop.xlane.xlu0 %781 }
 0x23b   : > { %v1658_v42 = vpop.eup %1657  ;;  %v878_v44 = vmul.f32 0.6931472, %v1656_v32  ;;  %1675 = vrcp.f32 %v786_v22 }
 0x23c   : > { %v1660_v47 = vpop.eup %1659  ;;  %v788_v49 = vpop.xlane.xlu1 %787  ;;  %v944_v50 = vsub.f32 %v843_v40, %v819_v36  ;;  %v820_v57 = vmul.f32 %v1658_v42, %v2102_v30  ;;  %v1171_v27 = vadd.f32 %v843_v40, %v819_v36 }
 0x23d   : > { %1677 = vrcp.f32 %v788_v49  ;;  %v891_v53 = vsub.f32 %v2072_v5, %v878_v44  ;;  %v1662_v55 = vpop.eup %1661  ;;  %v856_v21 = vmul.f32 0.6931472, %v1660_v47 }
 0x23e   : > { %1679 = vlog2.f32 %v788_v49  ;;  %v1008_v30 = vpack.c.bf16 %v820_v57, %v819_v36  ;;  %v817_v32 = vmul.f32 %v1662_v55, %v2105_v31 }
 0x23f   : > { %v1664_v63 = vpop.eup %1663  ;;  %v952_v26 = vsub.f32 %v891_v53, %v867_v52  ;;  %1681 = vlog2.f32 %v2184_v0  ;;  %v868_v18 = vsub.f32 %v2075_v8, %v856_v21 }
 0x240   : > { %v1666_v2 = vpop.eup %1665  ;;  %v844_v4 = vmul.f32 %v1664_v63, %v2108_v33  ;;  %v1142_v6 = vpop.permute.xlu1 %1141  ;;  %v1015_v53 = vmul.bf16 1069105081, %v1008_v30 }
 0x241   : > { %v1668_v7 = vpop.eup %1667  ;;  %v880_v10 = vmul.f32 0.6931472, %v1666_v2  ;;  %v2190_v1 = vmul.f32 %v952_v26, %v944_v50  ;;  %vm1162_vm3 = vcmp.eq.s32.totalorder %v2188_v11, %v1142_v6 }
 0x242   : > { %v1670_v5 = vpop.eup %1669  ;;  %v1032_v13 = vpack.c.bf16 %v844_v4, %v843_v40  ;;  %v2193_v14 = vadd.f32 %v844_v4, %v820_v57  ;;  %v945_v20 = vsub.f32 %v844_v4, %v820_v57  ;;  %v850_v44 = vmul.f32 0.6931472, %v1668_v7 }
 0x243   : > { %v1672_v16 = vpop.eup %1671  ;;  %v874_v17 = vmul.f32 0.6931472, %v1670_v5  ;;  %v892_v33 = vsub.f32 %v2083_v15, %v880_v10 }
 0x244   : > { %v1674_v22 = vpop.eup %1673  ;;  %v1145_v24 = vpop.permute.xlu1 %1144  ;;  %v1039_v28 = vmul.bf16 1069105081, %v1032_v13  ;;  %v818_v29 = vmul.f32 %v1672_v16, %v2113_v35  ;;  %v865_v63 = vsub.f32 %v2080_v12, %v850_v44 }
 0x245   : > { %v1676_v42 = vpop.eup %1675  ;;  %vm1163_vm2 = vcmp.eq.s32.totalorder %v2188_v11, %v1145_v24  ;;  %v953_v47 = vsub.f32 %v892_v33, %v868_v18  ;;  %v852_v52 = vmul.f32 0.6931472, %v1674_v22  ;;  %v889_v36 = vsub.f32 %v2077_v9, %v874_v17 }
 0x246   : > { %v1179_v49 = vsel %vm1163_vm2, %v1171_v27, 0.0  ;;  %1683 = vpow.bf16 %v1039_v28  ;;  %v2200_v50 = vpop.xlane.xlu0 %797  ;;  %v1007_v8 = vpack.c.bf16 %v818_v29, %v817_v32  ;;  %v841_v35 = vmul.f32 %v1676_v42, %v2110_v34 }
 0x247   : > { %v1678_v15 = vpop.eup %1677  ;;  %1189 = vadd.xlane.f32.xlu0 %v1179_v49  ;;  %1685 = vlog2.f32 %v2200_v50  ;;  %v2206_v55 = vmul.f32 %v953_v47, %v945_v20  ;;  %v950_v7 = vsub.f32 %v889_v36, %v865_v63  ;;  %v866_v10 = vsub.f32 %v2087_v19, %v852_v52 }
 0x248   : > { %v1680_v40 = vpop.eup %1679  ;;  %v842_v31 = vmul.f32 %v1678_v15, %v2126_v41  ;;  %v1012_v21 = vmul.bf16 1069105081, %v1007_v8  ;;  %1687 = vpow.bf16 %v1015_v53  ;;  %v942_v12 = vsub.f32 %v841_v35, %v817_v32 }
 0x249   : > { %v876_v57 = vmul.f32 0.6931472, %v1680_v40  ;;  %v1682_v34 = vpop.eup %1681  ;;  %v1169_v42 = vadd.f32 %v841_v35, %v817_v32 }
 0x24a   : > { %v2210_v26 = vpop.xlane.xlu0 %777  ;;  %v1170_v2 = vadd.f32 %v842_v31, %v818_v29  ;;  %v1031_v4 = vpack.c.bf16 %v842_v31, %v841_v35  ;;  %v943_v9 = vsub.f32 %v842_v31, %v818_v29  ;;  %v958_v16 = vmul.f32 %v950_v7, %v942_v12 }
 0x24b   : > { %v890_v41 = vsub.f32 %v2092_v23, %v876_v57  ;;  %1689 = vlog2.f32 %v2210_v26  ;;  %v862_v33 = vmul.f32 0.6931472, %v1682_v34 }
 0x24c   : > { %v1178_v5 = vsel %vm1162_vm3, %v1170_v2, 0.0  ;;  %v1036_v30 = vmul.bf16 1069105081, %v1031_v4  ;;  %1691 = vpow.bf16 %v1012_v21 }
 0x24d   : > { %1187 = vadd.xlane.f32.xlu1 %v1178_v5  ;;  %v951_v6 = vsub.f32 %v890_v41, %v866_v10  ;;  %v871_v22 = vsub.f32 %v2095_v25, %v862_v33 }
 0x24e   : > { %v794_v13 = vpop.xlane.xlu0 %793 }
 0x24f   : > { %v2215_v17 = vmul.f32 %v951_v6, %v943_v9  ;;  %1693 = vlog2.f32 %v794_v13 }
 0x250   : > { %1695 = vpow.bf16 %v1036_v30 }
 0x251   : > { %v1684_v18 = vpop.eup %1683  ;;  %966 = vadd.xlane.f32.xlu1 %v958_v16  ;;  %1697 = vrcp.f32 %v2184_v0 }
 0x252   : > { %v1686_v19 = vpop.eup %1685  ;;  %v1049_v23 = vunpack.c.l.bf16 %v1684_v18  ;;  %v1050_v44 = vunpack.c.h.bf16 %v1684_v18 }
 0x253   : > { %v886_v20 = vmul.f32 0.6931472, %v1686_v19  ;;  %v1688_v27 = vpop.eup %1687 }
 0x254   : > { %v1025_v25 = vunpack.c.l.bf16 %v1688_v27  ;;  %v1026_v35 = vunpack.c.h.bf16 %v1688_v27 }
 0x255   : > { %1099 = vadd.xlane.f32.xlu1 %v1049_v23  ;;  %v895_v24 = vsub.f32 %v2119_v38, %v886_v20  ;;  %v1690_v28 = vpop.eup %1689 }
 0x256   : > { %v1139_v29 = vpop.permute.xlu0 %1138  ;;  %v858_v15 = vmul.f32 0.6931472, %v1690_v28 }
 0x257   : > { %vm1161_vm4 = vcmp.eq.s32.totalorder %v2188_v11, %v1139_v29  ;;  %v2220_v47 = vsub.f32 %v895_v24, %v871_v22  ;;  %v1692_v49 = vpop.eup %1691 }
 0x258   : > { %v1177_v8 = vsel %vm1161_vm4, %v1169_v42, 0.0  ;;  %v1023_v36 = vunpack.c.l.bf16 %v1692_v49  ;;  %v869_v38 = vsub.f32 %v2117_v37, %v858_v15  ;;  %v1024_v63 = vunpack.c.h.bf16 %v1692_v49 }
 0x259   : > { %1101 = vadd.xlane.f32.xlu1 %v1050_v44  ;;  %1185 = vadd.xlane.f32.xlu0 %v1177_v8  ;;  %v1694_v52 = vpop.eup %1693  ;;  %vm1282_vm4 = vcmp.eq.s32.totalorder (!%p1496_p0), %v2188_v11, 2 }
 0x25a   : > { %v882_v53 = vmul.f32 0.6931472, %v1694_v52 }
 0x25b   : > { %v1696_v40 = vpop.eup %1695 }
 0x25c   : > { %v893_v32 = vsub.f32 %v2130_v43, %v882_v53  ;;  %v1048_v31 = vunpack.c.h.bf16 %v1696_v40  ;;  %v1047_v21 = vunpack.c.l.bf16 %v1696_v40  ;;  %v1698_v4 = vpop.eup %1697 }
 0x25d   : > { %1055 = vadd.xlane.f32.xlu1 %v1023_v36  ;;  %1059 = vadd.xlane.f32.xlu0 %v1025_v25  ;;  %v2233_v7 = vmul.f32 %v1698_v4, %v2122_v39 }
 0x25e   : > { %v2224_v57 = vsub.f32 %v893_v32, %v869_v38 }
 0x261   : > { %1097 = vadd.xlane.f32.xlu1 %v1048_v31  ;;  %1061 = vadd.xlane.f32.xlu0 %v1026_v35 }
 0x265   : > { %1057 = vadd.xlane.f32.xlu0 %v1024_v63 }
 0x269   : > { %1095 = vadd.xlane.f32.xlu0 %v1047_v21 }
 0x275   : > { %v2227_v2 = vpop.xlane.xlu1 %783 }
 0x276   : > { %1699 = vrcp.f32 %v2227_v2 }
 0x277   : > { %1701 = vrcp.f32 %v2200_v50 }
 0x279   : > { %v800_v37 = vpop.xlane.xlu1 %799 }
 0x27a   : > { %1703 = vrcp.f32 %v800_v37 }
 0x27b   : > { %1705 = vrcp.f32 %v2210_v26 }
 0x27d   : > { %v780_v43 = vpop.xlane.xlu1 %779 }
 0x27e   : > { %1707 = vrcp.f32 %v780_v43 }
 0x27f   : > { %1709 = vrcp.f32 %v794_v13 }
 0x280   : > { %v1700_v9 = vpop.eup %1699 }
 0x281   : > { %v2236_v0 = vmul.f32 %v1700_v9, %v2162_v62  ;;  %v796_v10 = vpop.xlane.xlu1 %795  ;;  %v1702_v41 = vpop.eup %1701 }
 0x282   : > { %1711 = vrcp.f32 %v796_v10  ;;  %v2241_v26 = vmul.f32 %v1702_v41, %v2134_v45 }
 0x283   : > { %v1010_v50 = vpack.c.bf16 %v2236_v0, %v2233_v7 }
 0x284   : > { %v1704_v34 = vpop.eup %1703 }
 0x285   : > { %v2244_v5 = vmul.f32 %v1704_v34, %v2165_v58  ;;  %v1021_v12 = vmul.bf16 1069105081, %v1010_v50  ;;  %v1706_v30 = vpop.eup %1705 }
 0x286   : > { %v2249_v6 = vmul.f32 %v1706_v30, %v2137_v46 }
 0x287   : > { %1713 = vpow.bf16 %v1021_v12  ;;  %v1034_v39 = vpack.c.bf16 %v2244_v5, %v2241_v26 }
 0x288   : > { %v1708_v62 = vpop.eup %1707 }
 0x289   : > { %v2252_v13 = vmul.f32 %v1708_v62, %v2168_v3  ;;  %v1045_v16 = vmul.bf16 1069105081, %v1034_v39  ;;  %v1710_v18 = vpop.eup %1709  ;;  %v1176_v39 = vadd.f32 %v2244_v5, %v2236_v0 }
 0x28a   : > { %v845_v33 = vmul.f32 %v1710_v18, %v2141_v48  ;;  %v1148_v48 = vpop.permute.xlu1 %1147 }
 0x28b   : > { %1715 = vpow.bf16 %v1045_v16  ;;  %v1009_v45 = vpack.c.bf16 %v2252_v13, %v2249_v6  ;;  %vm1164_vm5 = vcmp.eq.s32.totalorder %v2188_v11, %v1148_v48 }
 0x28c   : > { %v1712_v58 = vpop.eup %1711  ;;  %v1180_v38 = vsel %vm1164_vm5, %v2193_v14, 0.0  ;;  %v1173_v31 = vadd.f32 %v845_v33, %v2249_v6  ;;  %v946_v14 = vsub.f32 %v845_v33, %v2249_v6  ;;  %vm1280_vm5 = vcmp.eq.s32.totalorder (!%p1496_p0), %v2188_v11, 1 }
 0x28d   : > { %v2258_v19 = vmul.f32 %v1712_v58, %v2171_v60  ;;  %v1018_v23 = vmul.bf16 1069105081, %v1009_v45 }
 0x28e   : > { %v1151_v15 = vpop.permute.xlu1 %1150 }
 0x28f   : > { %1717 = vpow.bf16 %v1018_v23  ;;  %v1033_v46 = vpack.c.bf16 %v2258_v19, %v845_v33  ;;  %vm1165_vm6 = vcmp.eq.s32.totalorder %v2188_v11, %v1151_v15 }
 0x291   : > { %v1042_v20 = vmul.bf16 1069105081, %v1033_v46 }
 0x292   : > { %v1714_v22 = vpop.eup %1713  ;;  %v1154_v25 = vpop.permute.xlu1 %1153 }
 0x293   : > { %v1029_v3 = vunpack.c.l.bf16 %v1714_v22  ;;  %1719 = vpow.bf16 %v1042_v20  ;;  %v1030_v28 = vunpack.c.h.bf16 %v1714_v22  ;;  %vm1166_vm7 = vcmp.eq.s32.totalorder %v2188_v11, %v1154_v25  ;;  %v2317_v20 = vld [vmem:[%s1997_s23 + $0x28] sm:$0xff] }
 0x294   : > { %1721 = vlog2.f32 %v796_v10  ;;  %v1260_v22 = vsel %vm1226_vm10, %v2317_v20, 0.0 }
 0x295   : > { %1067 = vadd.xlane.f32.xlu0 %v1029_v3  ;;  %1723 = vlog2.f32 %v780_v43 }
 0x296   : > { %v1716_v24 = vpop.eup %1715  ;;  %1725 = vlog2.f32 %v800_v37  ;;  %v1157_v21 = vpop.permute.xlu1 %1156 }
 0x297   : > { %v1053_v27 = vunpack.c.l.bf16 %v1716_v24  ;;  %v1054_v42 = vunpack.c.h.bf16 %v1716_v24  ;;  %1727 = vlog2.f32 %v2227_v2  ;;  %v1181_v2 = vsel %vm1165_vm6, %v1173_v31, 0.0  ;;  %v2322_v24 = vld [vmem:[%s1997_s23 + $0x30] sm:$0xff] }
 0x298   : > { %vm1167_vm8 = vcmp.eq.s32.totalorder %v2188_v11, %v1157_v21  ;;  %vm1278_vm6 = vcmp.eq.s32.totalorder (!%p1496_p0), %v2188_v11, 0 }
 0x299   : > { %1107 = vadd.xlane.f32.xlu1 %v1053_v27  ;;  %1069 = vadd.xlane.f32.xlu0 %v1030_v28  ;;  %v1262_v28 = vsel %vm1226_vm10, %v2322_v24, 0.0 }
 0x29a   : > { %v1718_v29 = vpop.eup %1717  ;;  %v1160_v41 = vpop.permute.xlu1 %1159 }
 0x29b   : > { %v1027_v60 = vunpack.c.l.bf16 %v1718_v29  ;;  %v1028_v8 = vunpack.c.h.bf16 %v1718_v29  ;;  %vm1168_vm9 = vcmp.eq.s32.totalorder %v2188_v11, %v1160_v41  ;;  %v2327_v29 = vld [vmem:[%s1997_s23 + $0x38] sm:$0xff] }
 0x29c   : > { %v1184_v6 = vsel %vm1168_vm9, %v1176_v39, 0.0 }
 0x29d   : > { %1109 = vadd.xlane.f32.xlu1 %v1054_v42  ;;  %1063 = vadd.xlane.f32.xlu0 %v1027_v60  ;;  %v1264_v42 = vsel %vm1226_vm10, %v2327_v29, 0.0 }
 0x29e   : > { %v1720_v44 = vpop.eup %1719 }
 0x29f   : > { %v1051_v49 = vunpack.c.l.bf16 %v1720_v44  ;;  %v1052_v52 = vunpack.c.h.bf16 %v1720_v44  ;;  %v1722_v53 = vpop.eup %1721 }
 0x2a0   : > { %v1724_v36 = vpop.eup %1723  ;;  %v884_v40 = vmul.f32 0.6931472, %v1722_v53  ;;  %v1250_v53 = vld [vmem:[#allocation4] sm:$0x1] }
 0x2a1   : > { %1103 = vadd.xlane.f32.xlu1 %v1051_v49  ;;  %1065 = vadd.xlane.f32.xlu0 %v1028_v8  ;;  %v860_v32 = vmul.f32 0.6931472, %v1724_v36  ;;  %v1726_v63 = vpop.eup %1725 }
 0x2a2   : > { %v894_v35 = vsub.f32 %v2159_v56, %v884_v40  ;;  %v1728_v43 = vpop.eup %1727  ;;  %v888_v4 = vmul.f32 0.6931472, %v1726_v63 }
 0x2a3   : > { %v870_v37 = vsub.f32 %v2154_v61, %v860_v32  ;;  %v864_v10 = vmul.f32 0.6931472, %v1728_v43  ;;  %v1175_v61 = vadd.f32 %v2241_v26, %v2233_v7 }
 0x2a4   : > { %v896_v34 = vsub.f32 %v2151_v59, %v888_v4 }
 0x2a5   : > { %1105 = vadd.xlane.f32.xlu1 %v1052_v52  ;;  %968 = vadd.xlane.f32.xlu0 %v2215_v17  ;;  %v1174_v17 = vadd.f32 %v2258_v19, %v2252_v13  ;;  %v955_v56 = vsub.f32 %v894_v35, %v870_v37  ;;  %v1183_v12 = vsel %vm1167_vm8, %v1175_v61, 0.0  ;;  %v872_v30 = vsub.f32 %v2147_v54, %v864_v10  ;;  %v2295_v54 = vld [vmem:[%s1997_s23] sm:$0xff] }
 0x2a7   : > { %v1182_v9 = vsel %vm1166_vm7, %v1174_v17, 0.0  ;;  %v957_v59 = vsub.f32 %v896_v34, %v872_v30 }
 0x2a9   : > { %1191 = vadd.xlane.f32.xlu1 %v1180_v38  ;;  %970 = vadd.xlane.f32.xlu0 %v2190_v1  ;;  %v962_v1 = vmul.f32 %v2224_v57, %v946_v14  ;;  %v948_v57 = vsub.f32 %v2241_v26, %v2233_v7  ;;  %v2292_v7 = vld [vmem:[%s1997_s23 + $0x8] sm:$0xff]  ;;  %v2298_v26 = vld [vmem:[%s1997_s23 + $0x10] sm:$0xff] }
 0x2aa   : > { %v1252_v18 = vsel %vm1226_vm10, %v2292_v7, 0.0 }
 0x2ab   : > { %v964_v62 = vmul.f32 %v2220_v47, %v948_v57  ;;  %v1251_v47 = vsel %vm1226_vm10, %v2295_v54, 0.0 }
 0x2ac   : > { %v1253_v45 = vadd.f32 %v1252_v18, %v1251_v47 }
 0x2ad   : > { %1193 = vadd.xlane.f32.xlu1 %v1181_v2  ;;  %972 = vadd.xlane.f32.xlu0 %v2206_v55  ;;  %v947_v55 = vsub.f32 %v2258_v19, %v2252_v13  ;;  %v949_v13 = vsub.f32 %v2244_v5, %v2236_v0  ;;  %v1254_v0 = vsel %vm1226_vm10, %v2298_v26, 0.0  ;;  %v2307_v5 = vld [vmem:[%s1997_s23 + $0x18] sm:$0xff]  ;;  %v2312_v19 = vld [vmem:[%s1997_s23 + $0x20] sm:$0xff] }
 0x2ae   : > { %v1256_v58 = vsel %vm1226_vm10, %v2307_v5, 0.0  ;;  %v1255_v33 = vadd.f32 %v1254_v0, %v1253_v45  ;;  %v1258_v23 = vsel %vm1226_vm10, %v2312_v19, 0.0 }
 0x2af   : > { %v963_v50 = vmul.f32 %v955_v56, %v947_v55  ;;  %v965_v16 = vmul.f32 %v957_v59, %v949_v13 }
 0x2b0   : > { %v1257_v46 = vadd.f32 %v1256_v58, %v1255_v33 }
 0x2b1   : > { %1195 = vadd.xlane.f32.xlu1 %v1182_v9  ;;  %974 = vadd.xlane.f32.xlu0 %v962_v1 }
 0x2b2   : > { %v1259_v3 = vadd.f32 %v1258_v23, %v1257_v46 }
 0x2b4   : > { %v1261_v27 = vadd.f32 %v1260_v22, %v1259_v3 }
 0x2b5   : > { %1197 = vadd.xlane.f32.xlu1 %v1183_v12  ;;  %976 = vadd.xlane.f32.xlu0 %v963_v50 }
 0x2b6   : > { %v1263_v48 = vadd.f32 %v1262_v28, %v1261_v27 }
 0x2b8   : > { %v1265_v60 = vadd.f32 %v1264_v42, %v1263_v48 }
 0x2b9   : > { %1199 = vadd.xlane.f32.xlu1 %v1184_v6  ;;  %978 = vadd.xlane.f32.xlu0 %v964_v62  ;;  %v2342_v62 = vshrl.u32 %v900_v51, 7 }
 0x2ba   : > { %v1266_v44 = vrot.slane %v1265_v60, 4 }
 0x2bb   : > { %v902_v23 = vadd.s32 8, %v2342_v62  ;;  %v903_v28 = vadd.s32 16, %v2342_v62 }
 0x2bc   : > { %v1267_v49 = vadd.f32 %v1266_v44, %v1265_v60 }
 0x2bd   : > { %980 = vadd.xlane.f32.xlu1 %v965_v16  ;;  %v2344_v16 = vstv %s1471_s29 }
 0x2be   : > { %v1268_v8 = vrot.slane %v1267_v49, 2  ;;  %v910_v46 = vadd.s32 %v2344_v16, %v2342_v62 }
 0x2c0   : > { %v1269_v15 = vadd.f32 %v1268_v8, %v1267_v49  ;;  %vm918_vm12 = vcmp.lt.s32.totalorder %v910_v46, 200 }
 0x2c2   : > { %v1270_v52 = vrot.slane %v1269_v15, 1 }
 0x2c4   : > { %v1271_v36 = vadd.f32 %v1270_v52, %v1269_v15  ;;  %v904_v15 = vadd.s32 24, %v2342_v62 }
 0x2c6   : > { %v1272_v25 = vadd.f32 %v1271_v36, %v1250_v53  ;;  %v911_v36 = vadd.s32 %v2344_v16, %v902_v23 }
 0x2c8   : > { %1273 = vst.msk [vmem:[#allocation4] sm:$0x1] %vm1005_vm11, %v1272_v25  ;;  %v905_v25 = vadd.s32 32, %v2342_v62  ;;  %vm919_vm13 = vcmp.lt.s32.totalorder %v911_v36, 200 }
 0x2d4   : > { %v2332_v40 = vpop.xlane.xlu0 %1189 }
 0x2da   : > { %v2334_v38 = vpop.xlane.xlu1 %1187 }
 0x2de   : > { %v2338_v31 = vpop.xlane.xlu1 %966 }
 0x2e2   : > { %v1100_v63 = vpop.xlane.xlu1 %1099 }
 0x2e3   : > { %v1490_v55 = vadd.f32 -112.0, %v1100_v63 }
 0x2e6   : > { %v2336_v32 = vpop.xlane.xlu0 %1185  ;;  %v1102_v2 = vpop.xlane.xlu1 %1101 }
 0x2e7   : > { %v1491_v50 = vadd.f32 -112.0, %v1102_v2 }
 0x2ea   : > { %v1060_v35 = vpop.xlane.xlu0 %1059  ;;  %v1056_v14 = vpop.xlane.xlu1 %1055 }
 0x2eb   : > { %v1480_v1 = vadd.f32 -112.0, %v1056_v14  ;;  %v1482_v10 = vadd.f32 -112.0, %v1060_v35 }
 0x2ee   : > { %v1062_v21 = vpop.xlane.xlu0 %1061  ;;  %v1098_v43 = vpop.xlane.xlu1 %1097 }
 0x2ef   : > { %v1489_v9 = vadd.f32 -112.0, %v1098_v43  ;;  %v1483_v61 = vadd.f32 -112.0, %v1062_v21 }
 0x2f2   : > { %v1058_v17 = vpop.xlane.xlu0 %1057 }
 0x2f3   : > { %v1481_v56 = vadd.f32 -112.0, %v1058_v17  ;;  %v906_v17 = vadd.s32 40, %v2342_v62 }
 0x2f6   : > { %v1096_v37 = vpop.xlane.xlu0 %1095 }
 0x2f7   : > { %v1488_v4 = vadd.f32 -112.0, %v1096_v37 }
 0x2f9   : > { %1729 = vlog2.f32 %v1488_v4  ;;  %v912_v4 = vadd.s32 %v2344_v16, %v903_v28 }
 0x2fa   : > { %1731 = vlog2.f32 %v1480_v1 }
 0x2fb   : > { %1733 = vlog2.f32 %v1481_v56  ;;  %vm920_vm14 = vcmp.lt.s32.totalorder %v912_v4, 200 }
 0x2fc   : > { %1735 = vlog2.f32 %v1489_v9  ;;  %v913_v9 = vadd.s32 %v2344_v16, %v904_v15 }
 0x2fd   : > { %1737 = vlog2.f32 %v1482_v10 }
 0x2fe   : > { %1739 = vlog2.f32 %v1490_v55  ;;  %v914_v55 = vadd.s32 %v2344_v16, %v905_v25  ;;  %vm921_vm15 = vcmp.lt.s32.totalorder %v913_v9, 200 }
 0x2ff   : > { %1741 = vlog2.f32 %v1483_v61 }
 0x300   : > { %1743 = vlog2.f32 %v1491_v50  ;;  %vm922_vm0 = vcmp.lt.s32.totalorder %v914_v55, 200 }
 0x303   : > { %v1730_v57 = vpop.eup %1729 }
 0x304   : > { %v1732_v30 = vpop.eup %1731  ;;  %v1120_v47 = vmul.f32 0.6931472, %v1730_v57 }
 0x305   : > { %v1734_v39 = vpop.eup %1733  ;;  %v1080_v58 = vmul.f32 0.6931472, %v1732_v30 }
 0x306   : > { %v1736_v13 = vpop.eup %1735  ;;  %v1082_v33 = vmul.f32 0.6931472, %v1734_v39  ;;  %v1861_v39 = vmov 0.0  }
 0x307   : > { %v1738_v45 = vpop.eup %1737  ;;  %v1122_v22 = vmul.f32 0.6931472, %v1736_v13  ;;  %v1201_v42 = vadd.f32 %v1120_v47, %v1080_v58  ;;  %v1473_v47 = vsel %vm919_vm13, 1.0, %v1861_v39  ;;  %v1475_v23 = vsel %vm921_vm15, 1.0, %v1861_v39 }
 0x308   : > { %v1740_v48 = vpop.eup %1739  ;;  %v1084_v49 = vmul.f32 0.6931472, %v1738_v45 }
 0x309   : > { %v1742_v52 = vpop.eup %1741  ;;  %v1202_v53 = vadd.f32 %v1122_v22, %v1082_v33  ;;  %v1124_v35 = vmul.f32 0.6931472, %v1740_v48  ;;  %v1209_v37 = vsub.f32 %v1201_v42, %v2336_v32  ;;  %v915_v32 = vadd.s32 %v2344_v16, %v906_v17 }
 0x30a   : > { %v1744_v14 = vpop.eup %1743  ;;  %v1086_v56 = vmul.f32 0.6931472, %v1742_v52  ;;  %v1474_v33 = vsel %vm920_vm14, 1.0, %v1861_v39 }
 0x30b   : > { %v1203_v1 = vadd.f32 %v1124_v35, %v1084_v49  ;;  %v1210_v10 = vsub.f32 %v1202_v53, %v2334_v38  ;;  %vm923_vm1 = vcmp.lt.s32.totalorder %v915_v32, 200 }
 0x30d   : > { %v1211_v57 = vsub.f32 %v1203_v1, %v2332_v40 }
 0x322   : > { %v1068_v41 = vpop.xlane.xlu0 %1067 }
 0x323   : > { %v1486_v3 = vadd.f32 -112.0, %v1068_v41  ;;  %v1126_v41 = vmul.f32 0.6931472, %v1744_v14 }
 0x325   : > { %v1204_v30 = vadd.f32 %v1126_v41, %v1086_v56 }
 0x326   : > { %v1108_v34 = vpop.xlane.xlu1 %1107  ;;  %v1070_v12 = vpop.xlane.xlu0 %1069 }
 0x327   : > { %v1494_v0 = vadd.f32 -112.0, %v1108_v34  ;;  %v1487_v63 = vadd.f32 -112.0, %v1070_v12  ;;  %v907_v34 = vadd.s32 48, %v2342_v62  ;;  %v1218_v12 = vmul.f32 %v1209_v37, %v2295_v54 }
 0x329   : > { %v916_v40 = vadd.s32 %v2344_v16, %v907_v34  ;;  %v1227_v58 = vsel %vm1226_vm10, %v1218_v12, 0.0 }
 0x32a   : > { %v1110_v59 = vpop.xlane.xlu1 %1109  ;;  %v1064_v6 = vpop.xlane.xlu0 %1063 }
 0x32b   : > { %v1484_v18 = vadd.f32 -112.0, %v1064_v6  ;;  %v1495_v8 = vadd.f32 -112.0, %v1110_v59  ;;  %v1472_v59 = vsel %vm918_vm12, 1.0, %v1861_v39  ;;  %v1219_v6 = vmul.f32 %v1210_v10, %v2292_v7 }
 0x32c   : > { %v908_v7 = vadd.s32 56, %v2342_v62  ;;  %vm924_vm2 = vcmp.lt.s32.totalorder %v916_v40, 200  ;;  %v983_v25 = vmul.f32 %v1472_v59, %v2338_v31 }
 0x32d   : > { %1745 = vlog2.f32 %v1484_v18 }
 0x32e   : > { %v1104_v51 = vpop.xlane.xlu1 %1103  ;;  %v1066_v27 = vpop.xlane.xlu0 %1065  ;;  %1747 = vlog2.f32 %v1494_v0 }
 0x32f   : > { %v1492_v60 = vadd.f32 -112.0, %v1104_v51  ;;  %v1485_v44 = vadd.f32 -112.0, %v1066_v27  ;;  %v1220_v51 = vmul.f32 %v1211_v57, %v2298_v26  ;;  %v1476_v27 = vsel %vm922_vm0, 1.0, %v1861_v39 }
 0x331   : > { %1749 = vlog2.f32 %v1492_v60  ;;  %v1228_v60 = vsel %vm1226_vm10, %v1219_v6, 0.0  ;;  %v1230_v37 = vsel %vm1226_vm10, %v1220_v51, 0.0 }
 0x332   : > { %1751 = vlog2.f32 %v1486_v3  ;;  %v1106_v21 = vpop.xlane.xlu1 %1105  ;;  %v969_v2 = vpop.xlane.xlu0 %968  ;;  %v1229_v15 = vadd.f32 %v1228_v60, %v1227_v58 }
 0x333   : > { %1753 = vlog2.f32 %v1485_v44  ;;  %v1493_v43 = vadd.f32 -112.0, %v1106_v21  ;;  %v984_v42 = vmul.f32 %v1473_v47, %v969_v2  ;;  %v1477_v44 = vsel %vm923_vm1, 1.0, %v1861_v39 }
 0x334   : > { %1755 = vlog2.f32 %v1495_v8  ;;  %v917_v21 = vadd.s32 %v2344_v16, %v908_v7  ;;  %v1231_v9 = vadd.f32 %v1230_v37, %v1229_v15 }
 0x335   : > { %1757 = vlog2.f32 %v1493_v43 }
 0x336   : > { %1759 = vlog2.f32 %v1487_v63  ;;  %v1192_v61 = vpop.xlane.xlu1 %1191  ;;  %v971_v50 = vpop.xlane.xlu0 %970  ;;  %vm925_vm3 = vcmp.lt.s32.totalorder %v917_v21, 200 }
 0x337   : > { %v1746_v38 = vpop.eup %1745  ;;  %v1212_v18 = vsub.f32 %v1204_v30, %v1192_v61  ;;  %v985_v63 = vmul.f32 %v1474_v33, %v971_v50  ;;  %v1478_v30 = vsel %vm924_vm2, 1.0, %v1861_v39  ;;  %v1479_v40 = vsel %vm925_vm3, 1.0, %v1861_v39 }
 0x338   : > { %v1748_v13 = vpop.eup %1747  ;;  %v1088_v22 = vmul.f32 0.6931472, %v1746_v38 }
 0x339   : > { %v1132_v48 = vmul.f32 0.6931472, %v1748_v13  ;;  %v1221_v8 = vmul.f32 %v1212_v18, %v2307_v5  ;;  %v991_v5 = vadd.f32 %v984_v42, %v983_v25  ;;  %v982_v25 = vld [vmem:[#allocation2] sm:$0x1] }
 0x33a   : > { %v1194_v0 = vpop.xlane.xlu1 %1193  ;;  %v973_v54 = vpop.xlane.xlu0 %972 }
 0x33b   : > { %v1750_v45 = vpop.eup %1749  ;;  %v986_v1 = vmul.f32 %v1475_v23, %v973_v54  ;;  %v1232_v10 = vsel %vm1226_vm10, %v1221_v8, 0.0  ;;  %v992_v16 = vadd.f32 %v991_v5, %v985_v63 }
 0x33c   : > { %v1752_v46 = vpop.eup %1751  ;;  %v1128_v3 = vmul.f32 0.6931472, %v1750_v45  ;;  %v1233_v38 = vadd.f32 %v1232_v10, %v1231_v9 }
 0x33d   : > { %v1754_v28 = vpop.eup %1753  ;;  %v1092_v35 = vmul.f32 0.6931472, %v1752_v46  ;;  %v993_v59 = vadd.f32 %v992_v16, %v986_v1 }
 0x33e   : > { %v1756_v49 = vpop.eup %1755  ;;  %v1205_v52 = vadd.f32 %v1128_v3, %v1088_v22  ;;  %v1196_v53 = vpop.xlane.xlu1 %1195  ;;  %v1090_v17 = vmul.f32 0.6931472, %v1754_v28 }
 0x33f   : > { %v975_v36 = vpop.xlane.xlu0 %974  ;;  %v1758_v26 = vpop.eup %1757  ;;  %v1134_v4 = vmul.f32 0.6931472, %v1756_v49  ;;  %v1207_v56 = vadd.f32 %v1132_v48, %v1092_v35 }
 0x340   : > { %v1760_v2 = vpop.eup %1759  ;;  %v1130_v14 = vmul.f32 0.6931472, %v1758_v26  ;;  %v1213_v43 = vsub.f32 %v1205_v52, %v1194_v0  ;;  %v987_v32 = vmul.f32 %v1476_v27, %v975_v36  ;;  %v1217_v26 = vld [vmem:[#allocation3] sm:$0x1] }
 0x341   : > { %v1094_v50 = vmul.f32 0.6931472, %v1760_v2 }
 0x342   : > { %v1222_v55 = vmul.f32 %v1213_v43, %v2312_v19  ;;  %v1206_v31 = vadd.f32 %v1130_v14, %v1090_v17  ;;  %v1198_v41 = vpop.xlane.xlu1 %1197  ;;  %v994_v45 = vadd.f32 %v993_v59, %v987_v32  ;;  %v1283_v17 = vld [vmem:[#allocation4] sm:$0x1] (!%p1496_p0)  ;;  %v1862_v14 = vmov (!%p1496_p0), 0  }
 0x343   : > { %v977_v61 = vpop.xlane.xlu0 %976  ;;  %v1215_v34 = vsub.f32 %v1207_v56, %v1198_v41  ;;  %v1208_v13 = vadd.f32 %v1134_v4, %v1094_v50  ;;  %1761 = vset.pattern.permute.xlu0 (!%p1496_p0), %v1862_v14  ;;  %1762 = vset.pattern.permute.xlu1 (!%p1496_p0), %v1862_v14  ;;  %v1291_v4 = vsub.s32 (!%p1496_p0), 0, %v2342_v62 }
 0x344   : > { %v1234_v12 = vsel %vm1226_vm10, %v1222_v55, 0.0  ;;  %v1214_v57 = vsub.f32 %v1206_v31, %v1196_v53  ;;  %v988_v6 = vmul.f32 %v1477_v44, %v977_v61  ;;  %1286 = vperm.xlu0 (!%p1496_p0), %1761, %v1283_v17  }
 0x345   : > { %v1224_v47 = vmul.f32 %v1215_v34, %v2322_v24  ;;  %v1235_v54 = vadd.f32 %v1234_v12, %v1233_v38 }
 0x346   : > { %v1223_v19 = vmul.f32 %v1214_v57, %v2317_v20  ;;  %v1200_v18 = vpop.xlane.xlu1 %1199  ;;  %v995_v46 = vadd.f32 %v994_v45, %v988_v6 }
 0x347   : > { %v979_v0 = vpop.xlane.xlu0 %978  ;;  %v1216_v58 = vsub.f32 %v1208_v13, %v1200_v18  ;;  %v1238_v3 = vsel %vm1226_vm10, %v1224_v47, 0.0 }
 0x348   : > { %v989_v33 = vmul.f32 %v1478_v30, %v979_v0  ;;  %v1236_v23 = vsel %vm1226_vm10, %v1223_v19, 0.0 }
 0x349   : > { %v1237_v7 = vadd.f32 %v1236_v23, %v1235_v54  ;;  %v1225_v22 = vmul.f32 %v1216_v58, %v2327_v29 }
 0x34a   : > { %v981_v51 = vpop.xlane.xlu1 %980  ;;  %v996_v27 = vadd.f32 %v995_v46, %v989_v33 }
 0x34b   : > { %v1239_v20 = vadd.f32 %v1238_v3, %v1237_v7  ;;  %v1240_v24 = vsel %vm1226_vm10, %v1225_v22, 0.0  ;;  %v990_v28 = vmul.f32 %v1479_v40, %v981_v51 }
 0x34d   : > { %v1241_v48 = vadd.f32 %v1240_v24, %v1239_v20  ;;  %v997_v42 = vadd.f32 %v996_v27, %v990_v28 }
 0x34f   : > { %v1242_v60 = vrot.slane %v1241_v48, 4  ;;  %v998_v44 = vrot.slane %v997_v42, 4 }
 0x351   : > { %v1243_v49 = vadd.f32 %v1242_v60, %v1241_v48  ;;  %v999_v8 = vadd.f32 %v998_v44, %v997_v42 }
 0x353   : > { %v1244_v15 = vrot.slane %v1243_v49, 2  ;;  %v1000_v39 = vrot.slane %v999_v8, 2 }
 0x355   : > { %v1245_v52 = vadd.f32 %v1244_v15, %v1243_v49  ;;  %v1001_v53 = vadd.f32 %v1000_v39, %v999_v8 }
 0x357   : > { %v1246_v36 = vrot.slane %v1245_v52, 1  ;;  %v1002_v29 = vrot.slane %v1001_v53, 1  ;;  %1277 = sbr.rel (%p1496_p0) target bundleno = 1002 (0x3ea), region = 60 }
 0x359   : > { %v1247_v35 = vadd.f32 %v1246_v36, %v1245_v52  ;;  %v1003_v63 = vadd.f32 %v1002_v29, %v1001_v53 }
 0x35b   : > { %v1248_v21 = vadd.f32 %v1247_v35, %v1217_v26  ;;  %v1004_v2 = vadd.f32 %v1003_v63, %v982_v25 }
 0x35d   : > { %1006 = vst.msk [vmem:[#allocation2] sm:$0x1] %vm1005_vm11, %v1004_v2  ;;  %1249 = vst.msk [vmem:[#allocation3] sm:$0x1] %vm1005_vm11, %v1248_v21 }
 0x364   : > { %v1279_v37 = vld [vmem:[#allocation2] sm:$0x1]  ;;  %v1281_v43 = vld [vmem:[#allocation3] sm:$0x1] }
 0x365   : > { %1306 = vperm.xlu1 %1762, %v1279_v37   ;;  %1296 = vperm.xlu0 %1761, %v1281_v43  }
 0x3c3   : > { %v1287_v5 = vpop.permute.xlu0 %1286 }
 0x3c4   : > { %v1292_v56 = vrot.slane %v1287_v5, %v1291_v4 }
 0x3c6   : > { %v1293_v31 = vsel %vm1282_vm4, %v1292_v56, 0.0 }
 0x3e4   : > { %v1307_v1 = vpop.permute.xlu1 %1306  ;;  %v1297_v9 = vpop.permute.xlu0 %1296 }
 0x3e5   : > { %v1312_v10 = vrot.slane %v1307_v1, %v1291_v4  ;;  %v1302_v55 = vrot.slane %v1297_v9, %v1291_v4 }
 0x3e7   : > { %v1303_v41 = vsel %vm1280_vm5, %v1302_v55, %v1293_v31 }
 0x3e8   : > { %v1313_v61 = vsel %vm1278_vm6, %v1312_v10, %v1303_v41 }
 0x3e9   : > { %1314 = vst [vmem:[%s2006_s18] sm:$0x1] %v1313_v61 }
 0x3ea PF: > { %s1497_s30 = sshll.u32 %s1845_s9, 4  ;;  %s1328_s23 = sshll.u32 %s2006_s18, 4  ;;  %s1329_s23 = int_to_ptr.vmem [resolvable:$true] %s1328_s23 }
 0x3eb   : > { %s2408_s19 = scalar_lea.hbm %s2466_s8, %s1497_s30  ;;  %s2482_s10 = sand.u32 1, %s1833_s28  }
 0x3ec   : > { %s1316_s21 = scalar_lea.sflag [#allocation6], %s2482_s10  ;;  %s1763_s22 = scalar_lea.vmem %s1329_s23, 16 }
 0x3ed   : > { %p1764_p1 = scmp.ne.s32.totalorder %s1329_s23, %s1763_s22  ;;  %s1863_s26 = smov [#allocation5]  }
 0x3ee   : > { %s1767_s13 = sshll.u32 %s1863_s26, 4  ;;  %s1768_s13 = int_to_ptr.vmem [resolvable:$false] %s1767_s13 }
 0x3ef   : > { %p1765_p2 = pnand %p1764_p1, %p1958_p3  ;;  %s1769_s14 = scalar_lea.vmem %s1768_s13, 32 }
 0x3f0   : > { %p1770_p5 = scmp.lt.s32.totalorder %s1329_s23, %s1768_s13  ;;  %p1771_p6 = scmp.lt.s32.totalorder %s1769_s14, %s1763_s22 }
 0x3f1   : > { %p1766_p4 = pneg %p1765_p2 }
 0x3f2   : > { %p1772_p7 = por %p1771_p6, %p1770_p5 }
 0x3f4   : > { %p1773_p8 = pnand %p1772_p7, %p1766_p4 }
 0x3f6   : > { %1776 = shalt.err (!%p1773_p8)
}
 0x3f7   : > { %s1777_s9 = scalar_lea.hbm %s2408_s19, 16  ;;  %s1781_s25 = scalar_lea.hbm %s2466_s8, 32 }
 0x3f8   : > { %p1778_p10 = scmp.ne.s32.totalorder %s2408_s19, %s1777_s9  ;;  %p1782_p13 = scmp.lt.u32.totalorder %s2408_s19, %s2466_s8 }
 0x3f9   : > { %p1783_p0 = scmp.lt.u32.totalorder %s1781_s25, %s1777_s9  ;;  %p1785_p2 = scmp.lt.u32.totalorder %s1777_s9, %s2408_s19 }
 0x3fa   : > { %p1779_p11 = pnand %p1778_p10, %p1958_p3 }
 0x3fb   : > { %p1784_p1 = por %p1783_p0, %p1782_p13 }
 0x3fc   : > { %p1780_p12 = pneg %p1779_p11 }
 0x3fd   : > { %p1786_p4 = por %p1785_p2, %p1784_p1 }
 0x3ff   : > { %p1787_p5 = pnand %p1786_p4, %p1780_p12 }
 0x401   : > { %1790 = shalt.err (!%p1787_p5)
}
 0x402   : > { %1536 = dma.vmem_to_hbm [thread:$0]  (%p1958_p3), %s1329_s23, 16, %s2408_s19, %s1316_s21  }
 0x403 PF: > { %p1542_p6 = scmp.ge.s32.totalorder %s1857_s12, 2  ;;  %s1340_s30 = sand.u32 1, %s1829_s27  }
 0x404   : > { %s1341_s15 = scalar_lea.sflag [#allocation6], %s1340_s30 }
 0x405   : > { %p1539_p7 = pnand %p1542_p6, %p1968_p9 }
 0x407   : > { %1824 = dma.done.wait (!%p1539_p7), %s1341_s15, 16  }
 0x408   : > { %1826 = vsyncadd (!%p1539_p7), %s1341_s15, 4294967280  ;;  %s21_s12 = sadd.s32 1, %s1857_s12   ;;  %s2484_s24 = sld [smem:[#allocation8_spill]] }
 0x409   : > { %p18_p8 = scmp.ge.s32.totalorder %s21_s12, 6   ;;  %s2485_s29 = sld [smem:[#allocation14_spill]] }
 0x40a   : > { %s2486_s30 = sld [smem:[#allocation9_spill]]  ;;  %s2487_s9 = sld [smem:[#allocation10_spill]] }
 0x40b   : > { %s2488_s10 = sld [smem:[#allocation11_spill]]  ;;  %s2489_s11 = sld [smem:[#allocation12_spill]] }
 0x40c   : > { %s2490_s27 = smov %s1833_s28  ;;  %20 = sbr.rel (!%p18_p8) target bundleno = 5 (0x5), region = 104 }
 0x40e   : > { %s2491_s28 = smov %s2484_s24 }
 0x413   :  { %1345 = vsyncpa [#allocation6], 1 }
 0x414   :  { %1347 = vsyncpa [#allocation6 + $0x1], 1 }

</bundles_post_ra>
